<compile_context>
chip_gen: v5e
topology: v5e:2x2
jax: 0.10.0
libtpu: 0.0.40
codegen_flags: <defaults>
</compile_context>

<pallas_src>
from functools import partial

import jax
import jax.numpy as jnp
from jax.experimental import pallas as pl
from jax.experimental.pallas import tpu as pltpu


# ----------------------------------------------------------------------------
# Pallas kernel: one invocation runs the full 2-layer LSTM over the sequence.
# Gate order everywhere inside the kernel is [i, f, o, g].
# ----------------------------------------------------------------------------
def _lstm_encoder_kernel(x2d_ref,      # (S*Bp, F)        matmul dtype
                         wih1_ref,     # (F, 4*H1)        matmul dtype
                         whh1_ref,     # (H1, 4*H1)       matmul dtype
                         b1_ref,       # (1, 4*H1)        f32
                         w2_ref,       # (H1+H2, 4*H2)    matmul dtype ([Wih2; Whh2])
                         b2_ref,       # (1, 4*H2)        f32
                         out_ref,      # (Bp, H2)         f32
                         xz_ref):      # scratch (S*Bp, 4*H1) f32
    Bp, H2 = out_ref.shape
    H1 = whh1_ref.shape[0]
    S = x2d_ref.shape[0] // Bp
    mdt = whh1_ref.dtype                       # matmul operand dtype (bf16 or f32)

    def dot(a, w):
        return jnp.dot(a.astype(mdt), w, preferred_element_type=jnp.float32)

    # ---- Phase 1 (fully parallel): hoisted layer-1 input projection ---------
    # One wide GEMM + one bias add; result stored lane-dense (4*H1 wide).
    xz_ref[...] = (
        jnp.dot(x2d_ref[...], wih1_ref[...], preferred_element_type=jnp.float32)
        + b1_ref[...])

    # Loop-invariant loads / broadcasts hoisted out of the recurrence.
    whh1 = whh1_ref[...]
    w2 = w2_ref[...]
    b2b = jnp.broadcast_to(b2_ref[...], (Bp, 4 * H2))

    # ---- Per-layer step functions (gate order [i, f, o, g]) -----------------
    def l1(t, h1, c1):
        off = pl.multiple_of(t * Bp, Bp)               # sublane-aligned row offset
        z = xz_ref[pl.ds(off, Bp), :] + dot(h1, whh1)  # (Bp, 4*H1)
        s = jax.nn.sigmoid(z[:, :3 * H1])              # one wide EUP op for i,f,o
        g = jnp.tanh(z[:, 3 * H1:])
        i, f, o = s[:, :H1], s[:, H1:2 * H1], s[:, 2 * H1:]
        c = f * c1 + i * g
        h = o * jnp.tanh(c)
        return h, c

    def l1_first():
        # t = 0: h0 = c0 = 0, so the recurrent dot and f*c terms vanish exactly.
        z = xz_ref[pl.ds(0, Bp), :]
        s = jax.nn.sigmoid(z[:, :3 * H1])
        g = jnp.tanh(z[:, 3 * H1:])
        i, o = s[:, :H1], s[:, 2 * H1:]
        c = i * g
        h = o * jnp.tanh(c)
        return h, c

    def l2(h1_in, h2, c2):
        # Fused ih+hh projection: one contraction over (H1 + H2).
        hc = jnp.concatenate([h1_in, h2], axis=1)      # (Bp, H1+H2)
        z = dot(hc, w2) + b2b                          # (Bp, 4*H2)
        s = jax.nn.sigmoid(z[:, :3 * H2])
        g = jnp.tanh(z[:, 3 * H2:])
        i, f, o = s[:, :H2], s[:, H2:2 * H2], s[:, 2 * H2:]
        c = f * c2 + i * g
        h = o * jnp.tanh(c)
        return h, c

    # ---- Phase 2: skew-pipelined sequential recurrence -----------------------
    # Iteration k computes L1(k) and L2(k-1); both only depend on the carry, so
    # they are independent chains inside one unrolled body.
    h1_0, c1_0 = l1_first()
    z2 = jnp.zeros((Bp, H2), jnp.float32)

    def body(k, carry):
        h1, c1, h2, c2 = carry                 # h1,c1 = step k-1 ; h2,c2 = step k-2
        h1n, c1n = l1(k, h1, c1)               # layer 1, step k
        h2n, c2n = l2(h1, h2, c2)              # layer 2, step k-1 (uses h1(k-1))
        return (h1n, c1n, h2n, c2n)

    h1_l, _, h2_l, c2_l = jax.lax.fori_loop(
        1, S, body, (h1_0, c1_0, z2, z2),
        unroll=min(max(S - 1, 1), 8))          # cap unroll for large S

    # Epilogue: layer 2 of the last step -> encoder output.
    h2_final, _ = l2(h1_l, h2_l, c2_l)
    out_ref[...] = h2_final


# ----------------------------------------------------------------------------
# One-time weight preparation (outside the jitted hot path).
# Input weights use the PyTorch-transposed layout (in_dim, 4*H), gate order
# [i, f, g, o]; combined bias b = bias_ih + bias_hh.
# ----------------------------------------------------------------------------
def prepare_encoder_params(wih1, whh1, b1, wih2, whh2, b2,
                           matmul_dtype=jnp.bfloat16):
    H1 = whh1.shape[0]
    H2 = whh2.shape[0]

    def reorder(w, H):
        # column gate order [i, f, g, o] -> [i, f, o, g]
        w = jnp.asarray(w, jnp.float32).reshape(w.shape[0], 4, H)
        w = w[:, jnp.array([0, 1, 3, 2]), :]
        return w.reshape(w.shape[0], 4 * H)

    wih1_f = reorder(wih1, H1).astype(matmul_dtype)
    whh1_f = reorder(whh1, H1).astype(matmul_dtype)
    b1_f = reorder(jnp.reshape(b1, (1, 4 * H1)), H1)                # f32
    w2_f = reorder(jnp.concatenate([wih2, whh2], axis=0), H2).astype(matmul_dtype)
    b2_f = reorder(jnp.reshape(b2, (1, 4 * H2)), H2)                # f32
    return wih1_f, whh1_f, b1_f, w2_f, b2_f


# ----------------------------------------------------------------------------
# Jitted wrapper
# ----------------------------------------------------------------------------
@jax.jit
def lstm_encoder(x, wih1_f, whh1_f, b1_f, w2_f, b2_f):
    """x: (B, seq_len, n_features); returns (B, embedding_dim) float32."""
    B, S, F = x.shape
    H1 = whh1_f.shape[0]
    H2 = b2_f.shape[1] // 4
    Bp = ((B + 7) // 8) * 8                        # fill f32 sublanes

    x = x.astype(jnp.float32)
    if Bp != B:
        x = jnp.pad(x, ((0, Bp - B), (0, 0), (0, 0)))
    # time-major, flattened for the hoisted projection: (S*Bp, F)
    x2d = jnp.transpose(x, (1, 0, 2)).reshape(S * Bp, F).astype(wih1_f.dtype)

    vspec = pl.BlockSpec(memory_space=pltpu.MemorySpace.VMEM)
    out = pl.pallas_call(
        _lstm_encoder_kernel,
        out_shape=jax.ShapeDtypeStruct((Bp, H2), jnp.float32),
        in_specs=[vspec] * 6,
        out_specs=vspec,
        scratch_shapes=[pltpu.VMEM((S * Bp, 4 * H1), jnp.float32)],
    )(x2d, wih1_f, whh1_f, b1_f, w2_f, b2_f)
    return out[:B]


# ----------------------------------------------------------------------------
# Pure-JAX reference (mirrors torch.nn.LSTM math, gate order [i, f, g, o]).
# ----------------------------------------------------------------------------
def _lstm_layer_ref(x_tm, wih, whh, b, H):
    def step(carry, x_t):
        h, c = carry
        z = x_t @ wih + h @ whh + b
        i = jax.nn.sigmoid(z[:, :H])
        f = jax.nn.sigmoid(z[:, H:2 * H])
        g = jnp.tanh(z[:, 2 * H:3 * H])
        o = jax.nn.sigmoid(z[:, 3 * H:])
        c = f * c + i * g
        h = o * jnp.tanh(c)
        return (h, c), h

    B = x_tm.shape[1]
    h0 = jnp.zeros((B, H), jnp.float32)
    c0 = jnp.zeros((B, H), jnp.float32)
    (h_n, _), hs = jax.lax.scan(step, (h0, c0), x_tm)
    return hs, h_n


def _encoder_ref(x, wih1, whh1, b1, wih2, whh2, b2):
    x_tm = jnp.transpose(x, (1, 0, 2))
    H1 = whh1.shape[0]
    H2 = whh2.shape[0]
    hs1, _ = _lstm_layer_ref(x_tm, wih1, whh1, b1.reshape(1, -1), H1)
    _, h_n2 = _lstm_layer_ref(hs1, wih2, whh2, b2.reshape(1, -1), H2)
    return h_n2


# ----------------------------------------------------------------------------
# Main
# ----------------------------------------------------------------------------
if __name__ == "__main__":
    batch = 2
    seq_len = 8
    n_features = 4
    embedding_dim = 32
    hidden_dim = 2 * embedding_dim     # 64

    key = jax.random.PRNGKey(0)
    keys = jax.random.split(key, 8)

    # PyTorch-style init: U(-k, k), k = 1/sqrt(hidden_size).
    k1 = 1.0 / jnp.sqrt(hidden_dim)
    k2 = 1.0 / jnp.sqrt(embedding_dim)

    wih1 = jax.random.uniform(keys[0], (n_features, 4 * hidden_dim),
                              jnp.float32, -k1, k1)
    whh1 = jax.random.uniform(keys[1], (hidden_dim, 4 * hidden_dim),
                              jnp.float32, -k1, k1)
    b1 = (jax.random.uniform(keys[2], (4 * hidden_dim,), jnp.float32, -k1, k1)
          + jax.random.uniform(keys[3], (4 * hidden_dim,), jnp.float32, -k1, k1))

    wih2 = jax.random.uniform(keys[4], (hidden_dim, 4 * embedding_dim),
                              jnp.float32, -k2, k2)
    whh2 = jax.random.uniform(keys[5], (embedding_dim, 4 * embedding_dim),
                              jnp.float32, -k2, k2)
    b2 = (jax.random.uniform(keys[6], (4 * embedding_dim,), jnp.float32, -k2, k2)
          + jax.random.uniform(keys[7], (4 * embedding_dim,), jnp.float32, -k2, k2))

    x = jax.random.normal(jax.random.PRNGKey(1),
                          (batch, seq_len, n_features), jnp.float32)

    ref = _encoder_ref(x, wih1, whh1, b1, wih2, whh2, b2)

    # f32-operand path: exact torch.nn.LSTM semantics (tight tolerance).
    params_f32 = prepare_encoder_params(wih1, whh1, b1, wih2, whh2, b2,
                                        matmul_dtype=jnp.float32)
    out_f32 = jax.block_until_ready(lstm_encoder(x, *params_f32))
    assert out_f32.shape == (batch, embedding_dim)
    assert jnp.allclose(out_f32, ref, atol=2e-5, rtol=1e-5), "f32 path mismatch"

    # bf16-operand / f32-accumulate path (MXU-native on v6e/v7x); loose tolerance.
    params_bf16 = prepare_encoder_params(wih1, whh1, b1, wih2, whh2, b2,
                                         matmul_dtype=jnp.bfloat16)
    out_bf16 = jax.block_until_ready(lstm_encoder(x, *params_bf16))
    assert out_bf16.shape == (batch, embedding_dim)
    assert jnp.allclose(out_bf16, ref, atol=5e-2, rtol=5e-2), "bf16 path mismatch"

    print("KERNEL_OK")
</pallas_src>

<mosaic_0001>
module attributes {stable_mosaic.version = 11 : i64} {
  func.func @_lstm_encoder_kernel(%arg0: memref<64x4xf32, #tpu.memory_space<vmem>>, %arg1: memref<4x256xf32, #tpu.memory_space<vmem>>, %arg2: memref<64x256xf32, #tpu.memory_space<vmem>>, %arg3: memref<1x256xf32, #tpu.memory_space<vmem>>, %arg4: memref<96x128xf32, #tpu.memory_space<vmem>>, %arg5: memref<1x128xf32, #tpu.memory_space<vmem>>, %arg6: memref<8x32xf32, #tpu.memory_space<vmem>>, %arg7: memref<64x256xf32, #tpu.memory_space<vmem>>) attributes {dimension_semantics = [], scalar_prefetch = 0 : i64, scratch_operands = 1 : i64, tpu.core_type = #tpu.core_type<tc>} {
    %c0 = arith.constant 0 : index
    %c0_0 = arith.constant 0 : index
    %0 = vector.load %arg0[%c0, %c0_0] : memref<64x4xf32, #tpu.memory_space<vmem>>, vector<64x4xf32>
    %c0_1 = arith.constant 0 : index
    %c0_2 = arith.constant 0 : index
    %1 = vector.load %arg1[%c0_1, %c0_2] : memref<4x256xf32, #tpu.memory_space<vmem>>, vector<4x256xf32>
    %cst = arith.constant dense<0.000000e+00> : vector<64x256xf32>
    %2 = tpu.matmul %0, %1, %cst {dimension_numbers = #tpu.dot_dimension_numbers<[1], [0], [0], [1], [0, 0, 1, 1], [], []>} : vector<64x4xf32>, vector<4x256xf32>, vector<64x256xf32> -> vector<64x256xf32>
    %c0_3 = arith.constant 0 : index
    %c0_4 = arith.constant 0 : index
    %3 = vector.load %arg3[%c0_3, %c0_4] : memref<1x256xf32, #tpu.memory_space<vmem>>, vector<1x256xf32>
    %4 = vector.broadcast %3 : vector<1x256xf32> to vector<64x256xf32>
    %5 = arith.addf %2, %4 : vector<64x256xf32>
    %c0_5 = arith.constant 0 : index
    %c0_6 = arith.constant 0 : index
    %6 = vector.load %arg7[%c0_5, %c0_6] : memref<64x256xf32, #tpu.memory_space<vmem>>, vector<64x256xf32>
    tpu.vector_store %arg7[%c0_5, %c0_6], %5 {strides = array<i32>} : memref<64x256xf32, #tpu.memory_space<vmem>>, vector<64x256xf32>,
    %c0_7 = arith.constant 0 : index
    %c0_8 = arith.constant 0 : index
    %7 = vector.load %arg2[%c0_7, %c0_8] : memref<64x256xf32, #tpu.memory_space<vmem>>, vector<64x256xf32>
    %c0_9 = arith.constant 0 : index
    %c0_10 = arith.constant 0 : index
    %8 = vector.load %arg4[%c0_9, %c0_10] : memref<96x128xf32, #tpu.memory_space<vmem>>, vector<96x128xf32>
    %c0_11 = arith.constant 0 : index
    %c0_12 = arith.constant 0 : index
    %9 = vector.load %arg5[%c0_11, %c0_12] : memref<1x128xf32, #tpu.memory_space<vmem>>, vector<1x128xf32>
    %10 = vector.shape_cast %9 : vector<1x128xf32> to vector<1x128xf32>
    %11 = vector.broadcast %10 : vector<1x128xf32> to vector<8x128xf32>
    %c0_13 = arith.constant 0 : index
    %c0_14 = arith.constant 0 : index
    %12 = vector.load %arg7[%c0_13, %c0_14] : memref<64x256xf32, #tpu.memory_space<vmem>>, vector<8x256xf32>
    %13 = vector.extract_strided_slice %12 {offsets = [0, 0], sizes = [8, 192], strides = [1, 1]} : vector<8x256xf32> to vector<8x192xf32>
    %14 = arith.negf %13 : vector<8x192xf32>
    %15 = math.exp %14 : vector<8x192xf32>
    %cst_15 = arith.constant 1.000000e+00 : f32
    %16 = vector.broadcast %cst_15 : f32 to vector<8x192xf32>
    %17 = arith.addf %16, %15 : vector<8x192xf32>
    %18 = arith.divf %16, %17 : vector<8x192xf32>
    %19 = vector.extract_strided_slice %12 {offsets = [0, 192], sizes = [8, 64], strides = [1, 1]} : vector<8x256xf32> to vector<8x64xf32>
    %20 = math.tanh %19 : vector<8x64xf32>
    %21 = vector.extract_strided_slice %18 {offsets = [0, 0], sizes = [8, 64], strides = [1, 1]} : vector<8x192xf32> to vector<8x64xf32>
    %22 = vector.extract_strided_slice %18 {offsets = [0, 128], sizes = [8, 64], strides = [1, 1]} : vector<8x192xf32> to vector<8x64xf32>
    %23 = arith.mulf %21, %20 : vector<8x64xf32>
    %24 = math.tanh %23 : vector<8x64xf32>
    %25 = arith.mulf %22, %24 : vector<8x64xf32>
    %cst_16 = arith.constant 0.000000e+00 : f32
    %26 = vector.broadcast %cst_16 : f32 to vector<8x32xf32>
    %c1_i32 = arith.constant 1 : i32
    %c8_i32 = arith.constant 8 : i32
    %27 = arith.muli %c1_i32, %c8_i32 : i32
    %28 = tpu.assume_multiple %27, 8 : i32
    %29 = arith.index_cast %28 : i32 to index
    %c0_17 = arith.constant 0 : index
    %30 = vector.load %arg7[%29, %c0_17] : memref<64x256xf32, #tpu.memory_space<vmem>>, vector<8x256xf32>
    %cst_18 = arith.constant dense<0.000000e+00> : vector<8x256xf32>
    %31 = tpu.matmul %25, %7, %cst_18 {dimension_numbers = #tpu.dot_dimension_numbers<[1], [0], [0], [1], [0, 0, 1, 1], [], []>} : vector<8x64xf32>, vector<64x256xf32>, vector<8x256xf32> -> vector<8x256xf32>
    %32 = arith.addf %30, %31 : vector<8x256xf32>
    %33 = vector.extract_strided_slice %32 {offsets = [0, 0], sizes = [8, 192], strides = [1, 1]} : vector<8x256xf32> to vector<8x192xf32>
    %34 = arith.negf %33 : vector<8x192xf32>
    %35 = math.exp %34 : vector<8x192xf32>
    %cst_19 = arith.constant 1.000000e+00 : f32
    %36 = vector.broadcast %cst_19 : f32 to vector<8x192xf32>
    %37 = arith.addf %36, %35 : vector<8x192xf32>
    %38 = arith.divf %36, %37 : vector<8x192xf32>
    %39 = vector.extract_strided_slice %32 {offsets = [0, 192], sizes = [8, 64], strides = [1, 1]} : vector<8x256xf32> to vector<8x64xf32>
    %40 = math.tanh %39 : vector<8x64xf32>
    %41 = vector.extract_strided_slice %38 {offsets = [0, 0], sizes = [8, 64], strides = [1, 1]} : vector<8x192xf32> to vector<8x64xf32>
    %42 = vector.extract_strided_slice %38 {offsets = [0, 64], sizes = [8, 64], strides = [1, 1]} : vector<8x192xf32> to vector<8x64xf32>
    %43 = vector.extract_strided_slice %38 {offsets = [0, 128], sizes = [8, 64], strides = [1, 1]} : vector<8x192xf32> to vector<8x64xf32>
    %44 = arith.mulf %42, %23 : vector<8x64xf32>
    %45 = arith.mulf %41, %40 : vector<8x64xf32>
    %46 = arith.addf %44, %45 : vector<8x64xf32>
    %47 = math.tanh %46 : vector<8x64xf32>
    %48 = arith.mulf %43, %47 : vector<8x64xf32>
    %49 = tpu.concatenate %25, %26 in 1 : vector<8x64xf32>, vector<8x32xf32> -> vector<8x96xf32>
    %cst_20 = arith.constant dense<0.000000e+00> : vector<8x128xf32>
    %50 = tpu.matmul %49, %8, %cst_20 {dimension_numbers = #tpu.dot_dimension_numbers<[1], [0], [0], [1], [0, 0, 1, 1], [], []>} : vector<8x96xf32>, vector<96x128xf32>, vector<8x128xf32> -> vector<8x128xf32>
    %51 = arith.addf %50, %11 : vector<8x128xf32>
    %52 = vector.extract_strided_slice %51 {offsets = [0, 0], sizes = [8, 96], strides = [1, 1]} : vector<8x128xf32> to vector<8x96xf32>
    %53 = arith.negf %52 : vector<8x96xf32>
    %54 = math.exp %53 : vector<8x96xf32>
    %cst_21 = arith.constant 1.000000e+00 : f32
    %55 = vector.broadcast %cst_21 : f32 to vector<8x96xf32>
    %56 = arith.addf %55, %54 : vector<8x96xf32>
    %57 = arith.divf %55, %56 : vector<8x96xf32>
    %58 = vector.extract_strided_slice %51 {offsets = [0, 96], sizes = [8, 32], strides = [1, 1]} : vector<8x128xf32> to vector<8x32xf32>
    %59 = math.tanh %58 : vector<8x32xf32>
    %60 = vector.extract_strided_slice %57 {offsets = [0, 0], sizes = [8, 32], strides = [1, 1]} : vector<8x96xf32> to vector<8x32xf32>
    %61 = vector.extract_strided_slice %57 {offsets = [0, 32], sizes = [8, 32], strides = [1, 1]} : vector<8x96xf32> to vector<8x32xf32>
    %62 = vector.extract_strided_slice %57 {offsets = [0, 64], sizes = [8, 32], strides = [1, 1]} : vector<8x96xf32> to vector<8x32xf32>
    %63 = arith.mulf %61, %26 : vector<8x32xf32>
    %64 = arith.mulf %60, %59 : vector<8x32xf32>
    %65 = arith.addf %63, %64 : vector<8x32xf32>
    %66 = math.tanh %65 : vector<8x32xf32>
    %67 = arith.mulf %62, %66 : vector<8x32xf32>
    %c2_i32 = arith.constant 2 : i32
    %c8_i32_22 = arith.constant 8 : i32
    %68 = arith.muli %c2_i32, %c8_i32_22 : i32
    %69 = tpu.assume_multiple %68, 8 : i32
    %70 = arith.index_cast %69 : i32 to index
    %c0_23 = arith.constant 0 : index
    %71 = vector.load %arg7[%70, %c0_23] : memref<64x256xf32, #tpu.memory_space<vmem>>, vector<8x256xf32>
    %cst_24 = arith.constant dense<0.000000e+00> : vector<8x256xf32>
    %72 = tpu.matmul %48, %7, %cst_24 {dimension_numbers = #tpu.dot_dimension_numbers<[1], [0], [0], [1], [0, 0, 1, 1], [], []>} : vector<8x64xf32>, vector<64x256xf32>, vector<8x256xf32> -> vector<8x256xf32>
    %73 = arith.addf %71, %72 : vector<8x256xf32>
    %74 = vector.extract_strided_slice %73 {offsets = [0, 0], sizes = [8, 192], strides = [1, 1]} : vector<8x256xf32> to vector<8x192xf32>
    %75 = arith.negf %74 : vector<8x192xf32>
    %76 = math.exp %75 : vector<8x192xf32>
    %cst_25 = arith.constant 1.000000e+00 : f32
    %77 = vector.broadcast %cst_25 : f32 to vector<8x192xf32>
    %78 = arith.addf %77, %76 : vector<8x192xf32>
    %79 = arith.divf %77, %78 : vector<8x192xf32>
    %80 = vector.extract_strided_slice %73 {offsets = [0, 192], sizes = [8, 64], strides = [1, 1]} : vector<8x256xf32> to vector<8x64xf32>
    %81 = math.tanh %80 : vector<8x64xf32>
    %82 = vector.extract_strided_slice %79 {offsets = [0, 0], sizes = [8, 64], strides = [1, 1]} : vector<8x192xf32> to vector<8x64xf32>
    %83 = vector.extract_strided_slice %79 {offsets = [0, 64], sizes = [8, 64], strides = [1, 1]} : vector<8x192xf32> to vector<8x64xf32>
    %84 = vector.extract_strided_slice %79 {offsets = [0, 128], sizes = [8, 64], strides = [1, 1]} : vector<8x192xf32> to vector<8x64xf32>
    %85 = arith.mulf %83, %46 : vector<8x64xf32>
    %86 = arith.mulf %82, %81 : vector<8x64xf32>
    %87 = arith.addf %85, %86 : vector<8x64xf32>
    %88 = math.tanh %87 : vector<8x64xf32>
    %89 = arith.mulf %84, %88 : vector<8x64xf32>
    %90 = tpu.concatenate %48, %67 in 1 : vector<8x64xf32>, vector<8x32xf32> -> vector<8x96xf32>
    %cst_26 = arith.constant dense<0.000000e+00> : vector<8x128xf32>
    %91 = tpu.matmul %90, %8, %cst_26 {dimension_numbers = #tpu.dot_dimension_numbers<[1], [0], [0], [1], [0, 0, 1, 1], [], []>} : vector<8x96xf32>, vector<96x128xf32>, vector<8x128xf32> -> vector<8x128xf32>
    %92 = arith.addf %91, %11 : vector<8x128xf32>
    %93 = vector.extract_strided_slice %92 {offsets = [0, 0], sizes = [8, 96], strides = [1, 1]} : vector<8x128xf32> to vector<8x96xf32>
    %94 = arith.negf %93 : vector<8x96xf32>
    %95 = math.exp %94 : vector<8x96xf32>
    %cst_27 = arith.constant 1.000000e+00 : f32
    %96 = vector.broadcast %cst_27 : f32 to vector<8x96xf32>
    %97 = arith.addf %96, %95 : vector<8x96xf32>
    %98 = arith.divf %96, %97 : vector<8x96xf32>
    %99 = vector.extract_strided_slice %92 {offsets = [0, 96], sizes = [8, 32], strides = [1, 1]} : vector<8x128xf32> to vector<8x32xf32>
    %100 = math.tanh %99 : vector<8x32xf32>
    %101 = vector.extract_strided_slice %98 {offsets = [0, 0], sizes = [8, 32], strides = [1, 1]} : vector<8x96xf32> to vector<8x32xf32>
    %102 = vector.extract_strided_slice %98 {offsets = [0, 32], sizes = [8, 32], strides = [1, 1]} : vector<8x96xf32> to vector<8x32xf32>
    %103 = vector.extract_strided_slice %98 {offsets = [0, 64], sizes = [8, 32], strides = [1, 1]} : vector<8x96xf32> to vector<8x32xf32>
    %104 = arith.mulf %102, %65 : vector<8x32xf32>
    %105 = arith.mulf %101, %100 : vector<8x32xf32>
    %106 = arith.addf %104, %105 : vector<8x32xf32>
    %107 = math.tanh %106 : vector<8x32xf32>
    %108 = arith.mulf %103, %107 : vector<8x32xf32>
    %c3_i32 = arith.constant 3 : i32
    %c8_i32_28 = arith.constant 8 : i32
    %109 = arith.muli %c3_i32, %c8_i32_28 : i32
    %110 = tpu.assume_multiple %109, 8 : i32
    %111 = arith.index_cast %110 : i32 to index
    %c0_29 = arith.constant 0 : index
    %112 = vector.load %arg7[%111, %c0_29] : memref<64x256xf32, #tpu.memory_space<vmem>>, vector<8x256xf32>
    %cst_30 = arith.constant dense<0.000000e+00> : vector<8x256xf32>
    %113 = tpu.matmul %89, %7, %cst_30 {dimension_numbers = #tpu.dot_dimension_numbers<[1], [0], [0], [1], [0, 0, 1, 1], [], []>} : vector<8x64xf32>, vector<64x256xf32>, vector<8x256xf32> -> vector<8x256xf32>
    %114 = arith.addf %112, %113 : vector<8x256xf32>
    %115 = vector.extract_strided_slice %114 {offsets = [0, 0], sizes = [8, 192], strides = [1, 1]} : vector<8x256xf32> to vector<8x192xf32>
    %116 = arith.negf %115 : vector<8x192xf32>
    %117 = math.exp %116 : vector<8x192xf32>
    %cst_31 = arith.constant 1.000000e+00 : f32
    %118 = vector.broadcast %cst_31 : f32 to vector<8x192xf32>
    %119 = arith.addf %118, %117 : vector<8x192xf32>
    %120 = arith.divf %118, %119 : vector<8x192xf32>
    %121 = vector.extract_strided_slice %114 {offsets = [0, 192], sizes = [8, 64], strides = [1, 1]} : vector<8x256xf32> to vector<8x64xf32>
    %122 = math.tanh %121 : vector<8x64xf32>
    %123 = vector.extract_strided_slice %120 {offsets = [0, 0], sizes = [8, 64], strides = [1, 1]} : vector<8x192xf32> to vector<8x64xf32>
    %124 = vector.extract_strided_slice %120 {offsets = [0, 64], sizes = [8, 64], strides = [1, 1]} : vector<8x192xf32> to vector<8x64xf32>
    %125 = vector.extract_strided_slice %120 {offsets = [0, 128], sizes = [8, 64], strides = [1, 1]} : vector<8x192xf32> to vector<8x64xf32>
    %126 = arith.mulf %124, %87 : vector<8x64xf32>
    %127 = arith.mulf %123, %122 : vector<8x64xf32>
    %128 = arith.addf %126, %127 : vector<8x64xf32>
    %129 = math.tanh %128 : vector<8x64xf32>
    %130 = arith.mulf %125, %129 : vector<8x64xf32>
    %131 = tpu.concatenate %89, %108 in 1 : vector<8x64xf32>, vector<8x32xf32> -> vector<8x96xf32>
    %cst_32 = arith.constant dense<0.000000e+00> : vector<8x128xf32>
    %132 = tpu.matmul %131, %8, %cst_32 {dimension_numbers = #tpu.dot_dimension_numbers<[1], [0], [0], [1], [0, 0, 1, 1], [], []>} : vector<8x96xf32>, vector<96x128xf32>, vector<8x128xf32> -> vector<8x128xf32>
    %133 = arith.addf %132, %11 : vector<8x128xf32>
    %134 = vector.extract_strided_slice %133 {offsets = [0, 0], sizes = [8, 96], strides = [1, 1]} : vector<8x128xf32> to vector<8x96xf32>
    %135 = arith.negf %134 : vector<8x96xf32>
    %136 = math.exp %135 : vector<8x96xf32>
    %cst_33 = arith.constant 1.000000e+00 : f32
    %137 = vector.broadcast %cst_33 : f32 to vector<8x96xf32>
    %138 = arith.addf %137, %136 : vector<8x96xf32>
    %139 = arith.divf %137, %138 : vector<8x96xf32>
    %140 = vector.extract_strided_slice %133 {offsets = [0, 96], sizes = [8, 32], strides = [1, 1]} : vector<8x128xf32> to vector<8x32xf32>
    %141 = math.tanh %140 : vector<8x32xf32>
    %142 = vector.extract_strided_slice %139 {offsets = [0, 0], sizes = [8, 32], strides = [1, 1]} : vector<8x96xf32> to vector<8x32xf32>
    %143 = vector.extract_strided_slice %139 {offsets = [0, 32], sizes = [8, 32], strides = [1, 1]} : vector<8x96xf32> to vector<8x32xf32>
    %144 = vector.extract_strided_slice %139 {offsets = [0, 64], sizes = [8, 32], strides = [1, 1]} : vector<8x96xf32> to vector<8x32xf32>
    %145 = arith.mulf %143, %106 : vector<8x32xf32>
    %146 = arith.mulf %142, %141 : vector<8x32xf32>
    %147 = arith.addf %145, %146 : vector<8x32xf32>
    %148 = math.tanh %147 : vector<8x32xf32>
    %149 = arith.mulf %144, %148 : vector<8x32xf32>
    %c4_i32 = arith.constant 4 : i32
    %c8_i32_34 = arith.constant 8 : i32
    %150 = arith.muli %c4_i32, %c8_i32_34 : i32
    %151 = tpu.assume_multiple %150, 8 : i32
    %152 = arith.index_cast %151 : i32 to index
    %c0_35 = arith.constant 0 : index
    %153 = vector.load %arg7[%152, %c0_35] : memref<64x256xf32, #tpu.memory_space<vmem>>, vector<8x256xf32>
    %cst_36 = arith.constant dense<0.000000e+00> : vector<8x256xf32>
    %154 = tpu.matmul %130, %7, %cst_36 {dimension_numbers = #tpu.dot_dimension_numbers<[1], [0], [0], [1], [0, 0, 1, 1], [], []>} : vector<8x64xf32>, vector<64x256xf32>, vector<8x256xf32> -> vector<8x256xf32>
    %155 = arith.addf %153, %154 : vector<8x256xf32>
    %156 = vector.extract_strided_slice %155 {offsets = [0, 0], sizes = [8, 192], strides = [1, 1]} : vector<8x256xf32> to vector<8x192xf32>
    %157 = arith.negf %156 : vector<8x192xf32>
    %158 = math.exp %157 : vector<8x192xf32>
    %cst_37 = arith.constant 1.000000e+00 : f32
    %159 = vector.broadcast %cst_37 : f32 to vector<8x192xf32>
    %160 = arith.addf %159, %158 : vector<8x192xf32>
    %161 = arith.divf %159, %160 : vector<8x192xf32>
    %162 = vector.extract_strided_slice %155 {offsets = [0, 192], sizes = [8, 64], strides = [1, 1]} : vector<8x256xf32> to vector<8x64xf32>
    %163 = math.tanh %162 : vector<8x64xf32>
    %164 = vector.extract_strided_slice %161 {offsets = [0, 0], sizes = [8, 64], strides = [1, 1]} : vector<8x192xf32> to vector<8x64xf32>
    %165 = vector.extract_strided_slice %161 {offsets = [0, 64], sizes = [8, 64], strides = [1, 1]} : vector<8x192xf32> to vector<8x64xf32>
    %166 = vector.extract_strided_slice %161 {offsets = [0, 128], sizes = [8, 64], strides = [1, 1]} : vector<8x192xf32> to vector<8x64xf32>
    %167 = arith.mulf %165, %128 : vector<8x64xf32>
    %168 = arith.mulf %164, %163 : vector<8x64xf32>
    %169 = arith.addf %167, %168 : vector<8x64xf32>
    %170 = math.tanh %169 : vector<8x64xf32>
    %171 = arith.mulf %166, %170 : vector<8x64xf32>
    %172 = tpu.concatenate %130, %149 in 1 : vector<8x64xf32>, vector<8x32xf32> -> vector<8x96xf32>
    %cst_38 = arith.constant dense<0.000000e+00> : vector<8x128xf32>
    %173 = tpu.matmul %172, %8, %cst_38 {dimension_numbers = #tpu.dot_dimension_numbers<[1], [0], [0], [1], [0, 0, 1, 1], [], []>} : vector<8x96xf32>, vector<96x128xf32>, vector<8x128xf32> -> vector<8x128xf32>
    %174 = arith.addf %173, %11 : vector<8x128xf32>
    %175 = vector.extract_strided_slice %174 {offsets = [0, 0], sizes = [8, 96], strides = [1, 1]} : vector<8x128xf32> to vector<8x96xf32>
    %176 = arith.negf %175 : vector<8x96xf32>
    %177 = math.exp %176 : vector<8x96xf32>
    %cst_39 = arith.constant 1.000000e+00 : f32
    %178 = vector.broadcast %cst_39 : f32 to vector<8x96xf32>
    %179 = arith.addf %178, %177 : vector<8x96xf32>
    %180 = arith.divf %178, %179 : vector<8x96xf32>
    %181 = vector.extract_strided_slice %174 {offsets = [0, 96], sizes = [8, 32], strides = [1, 1]} : vector<8x128xf32> to vector<8x32xf32>
    %182 = math.tanh %181 : vector<8x32xf32>
    %183 = vector.extract_strided_slice %180 {offsets = [0, 0], sizes = [8, 32], strides = [1, 1]} : vector<8x96xf32> to vector<8x32xf32>
    %184 = vector.extract_strided_slice %180 {offsets = [0, 32], sizes = [8, 32], strides = [1, 1]} : vector<8x96xf32> to vector<8x32xf32>
    %185 = vector.extract_strided_slice %180 {offsets = [0, 64], sizes = [8, 32], strides = [1, 1]} : vector<8x96xf32> to vector<8x32xf32>
    %186 = arith.mulf %184, %147 : vector<8x32xf32>
    %187 = arith.mulf %183, %182 : vector<8x32xf32>
    %188 = arith.addf %186, %187 : vector<8x32xf32>
    %189 = math.tanh %188 : vector<8x32xf32>
    %190 = arith.mulf %185, %189 : vector<8x32xf32>
    %c5_i32 = arith.constant 5 : i32
    %c8_i32_40 = arith.constant 8 : i32
    %191 = arith.muli %c5_i32, %c8_i32_40 : i32
    %192 = tpu.assume_multiple %191, 8 : i32
    %193 = arith.index_cast %192 : i32 to index
    %c0_41 = arith.constant 0 : index
    %194 = vector.load %arg7[%193, %c0_41] : memref<64x256xf32, #tpu.memory_space<vmem>>, vector<8x256xf32>
    %cst_42 = arith.constant dense<0.000000e+00> : vector<8x256xf32>
    %195 = tpu.matmul %171, %7, %cst_42 {dimension_numbers = #tpu.dot_dimension_numbers<[1], [0], [0], [1], [0, 0, 1, 1], [], []>} : vector<8x64xf32>, vector<64x256xf32>, vector<8x256xf32> -> vector<8x256xf32>
    %196 = arith.addf %194, %195 : vector<8x256xf32>
    %197 = vector.extract_strided_slice %196 {offsets = [0, 0], sizes = [8, 192], strides = [1, 1]} : vector<8x256xf32> to vector<8x192xf32>
    %198 = arith.negf %197 : vector<8x192xf32>
    %199 = math.exp %198 : vector<8x192xf32>
    %cst_43 = arith.constant 1.000000e+00 : f32
    %200 = vector.broadcast %cst_43 : f32 to vector<8x192xf32>
    %201 = arith.addf %200, %199 : vector<8x192xf32>
    %202 = arith.divf %200, %201 : vector<8x192xf32>
    %203 = vector.extract_strided_slice %196 {offsets = [0, 192], sizes = [8, 64], strides = [1, 1]} : vector<8x256xf32> to vector<8x64xf32>
    %204 = math.tanh %203 : vector<8x64xf32>
    %205 = vector.extract_strided_slice %202 {offsets = [0, 0], sizes = [8, 64], strides = [1, 1]} : vector<8x192xf32> to vector<8x64xf32>
    %206 = vector.extract_strided_slice %202 {offsets = [0, 64], sizes = [8, 64], strides = [1, 1]} : vector<8x192xf32> to vector<8x64xf32>
    %207 = vector.extract_strided_slice %202 {offsets = [0, 128], sizes = [8, 64], strides = [1, 1]} : vector<8x192xf32> to vector<8x64xf32>
    %208 = arith.mulf %206, %169 : vector<8x64xf32>
    %209 = arith.mulf %205, %204 : vector<8x64xf32>
    %210 = arith.addf %208, %209 : vector<8x64xf32>
    %211 = math.tanh %210 : vector<8x64xf32>
    %212 = arith.mulf %207, %211 : vector<8x64xf32>
    %213 = tpu.concatenate %171, %190 in 1 : vector<8x64xf32>, vector<8x32xf32> -> vector<8x96xf32>
    %cst_44 = arith.constant dense<0.000000e+00> : vector<8x128xf32>
    %214 = tpu.matmul %213, %8, %cst_44 {dimension_numbers = #tpu.dot_dimension_numbers<[1], [0], [0], [1], [0, 0, 1, 1], [], []>} : vector<8x96xf32>, vector<96x128xf32>, vector<8x128xf32> -> vector<8x128xf32>
    %215 = arith.addf %214, %11 : vector<8x128xf32>
    %216 = vector.extract_strided_slice %215 {offsets = [0, 0], sizes = [8, 96], strides = [1, 1]} : vector<8x128xf32> to vector<8x96xf32>
    %217 = arith.negf %216 : vector<8x96xf32>
    %218 = math.exp %217 : vector<8x96xf32>
    %cst_45 = arith.constant 1.000000e+00 : f32
    %219 = vector.broadcast %cst_45 : f32 to vector<8x96xf32>
    %220 = arith.addf %219, %218 : vector<8x96xf32>
    %221 = arith.divf %219, %220 : vector<8x96xf32>
    %222 = vector.extract_strided_slice %215 {offsets = [0, 96], sizes = [8, 32], strides = [1, 1]} : vector<8x128xf32> to vector<8x32xf32>
    %223 = math.tanh %222 : vector<8x32xf32>
    %224 = vector.extract_strided_slice %221 {offsets = [0, 0], sizes = [8, 32], strides = [1, 1]} : vector<8x96xf32> to vector<8x32xf32>
    %225 = vector.extract_strided_slice %221 {offsets = [0, 32], sizes = [8, 32], strides = [1, 1]} : vector<8x96xf32> to vector<8x32xf32>
    %226 = vector.extract_strided_slice %221 {offsets = [0, 64], sizes = [8, 32], strides = [1, 1]} : vector<8x96xf32> to vector<8x32xf32>
    %227 = arith.mulf %225, %188 : vector<8x32xf32>
    %228 = arith.mulf %224, %223 : vector<8x32xf32>
    %229 = arith.addf %227, %228 : vector<8x32xf32>
    %230 = math.tanh %229 : vector<8x32xf32>
    %231 = arith.mulf %226, %230 : vector<8x32xf32>
    %c6_i32 = arith.constant 6 : i32
    %c8_i32_46 = arith.constant 8 : i32
    %232 = arith.muli %c6_i32, %c8_i32_46 : i32
    %233 = tpu.assume_multiple %232, 8 : i32
    %234 = arith.index_cast %233 : i32 to index
    %c0_47 = arith.constant 0 : index
    %235 = vector.load %arg7[%234, %c0_47] : memref<64x256xf32, #tpu.memory_space<vmem>>, vector<8x256xf32>
    %cst_48 = arith.constant dense<0.000000e+00> : vector<8x256xf32>
    %236 = tpu.matmul %212, %7, %cst_48 {dimension_numbers = #tpu.dot_dimension_numbers<[1], [0], [0], [1], [0, 0, 1, 1], [], []>} : vector<8x64xf32>, vector<64x256xf32>, vector<8x256xf32> -> vector<8x256xf32>
    %237 = arith.addf %235, %236 : vector<8x256xf32>
    %238 = vector.extract_strided_slice %237 {offsets = [0, 0], sizes = [8, 192], strides = [1, 1]} : vector<8x256xf32> to vector<8x192xf32>
    %239 = arith.negf %238 : vector<8x192xf32>
    %240 = math.exp %239 : vector<8x192xf32>
    %cst_49 = arith.constant 1.000000e+00 : f32
    %241 = vector.broadcast %cst_49 : f32 to vector<8x192xf32>
    %242 = arith.addf %241, %240 : vector<8x192xf32>
    %243 = arith.divf %241, %242 : vector<8x192xf32>
    %244 = vector.extract_strided_slice %237 {offsets = [0, 192], sizes = [8, 64], strides = [1, 1]} : vector<8x256xf32> to vector<8x64xf32>
    %245 = math.tanh %244 : vector<8x64xf32>
    %246 = vector.extract_strided_slice %243 {offsets = [0, 0], sizes = [8, 64], strides = [1, 1]} : vector<8x192xf32> to vector<8x64xf32>
    %247 = vector.extract_strided_slice %243 {offsets = [0, 64], sizes = [8, 64], strides = [1, 1]} : vector<8x192xf32> to vector<8x64xf32>
    %248 = vector.extract_strided_slice %243 {offsets = [0, 128], sizes = [8, 64], strides = [1, 1]} : vector<8x192xf32> to vector<8x64xf32>
    %249 = arith.mulf %247, %210 : vector<8x64xf32>
    %250 = arith.mulf %246, %245 : vector<8x64xf32>
    %251 = arith.addf %249, %250 : vector<8x64xf32>
    %252 = math.tanh %251 : vector<8x64xf32>
    %253 = arith.mulf %248, %252 : vector<8x64xf32>
    %254 = tpu.concatenate %212, %231 in 1 : vector<8x64xf32>, vector<8x32xf32> -> vector<8x96xf32>
    %cst_50 = arith.constant dense<0.000000e+00> : vector<8x128xf32>
    %255 = tpu.matmul %254, %8, %cst_50 {dimension_numbers = #tpu.dot_dimension_numbers<[1], [0], [0], [1], [0, 0, 1, 1], [], []>} : vector<8x96xf32>, vector<96x128xf32>, vector<8x128xf32> -> vector<8x128xf32>
    %256 = arith.addf %255, %11 : vector<8x128xf32>
    %257 = vector.extract_strided_slice %256 {offsets = [0, 0], sizes = [8, 96], strides = [1, 1]} : vector<8x128xf32> to vector<8x96xf32>
    %258 = arith.negf %257 : vector<8x96xf32>
    %259 = math.exp %258 : vector<8x96xf32>
    %cst_51 = arith.constant 1.000000e+00 : f32
    %260 = vector.broadcast %cst_51 : f32 to vector<8x96xf32>
    %261 = arith.addf %260, %259 : vector<8x96xf32>
    %262 = arith.divf %260, %261 : vector<8x96xf32>
    %263 = vector.extract_strided_slice %256 {offsets = [0, 96], sizes = [8, 32], strides = [1, 1]} : vector<8x128xf32> to vector<8x32xf32>
    %264 = math.tanh %263 : vector<8x32xf32>
    %265 = vector.extract_strided_slice %262 {offsets = [0, 0], sizes = [8, 32], strides = [1, 1]} : vector<8x96xf32> to vector<8x32xf32>
    %266 = vector.extract_strided_slice %262 {offsets = [0, 32], sizes = [8, 32], strides = [1, 1]} : vector<8x96xf32> to vector<8x32xf32>
    %267 = vector.extract_strided_slice %262 {offsets = [0, 64], sizes = [8, 32], strides = [1, 1]} : vector<8x96xf32> to vector<8x32xf32>
    %268 = arith.mulf %266, %229 : vector<8x32xf32>
    %269 = arith.mulf %265, %264 : vector<8x32xf32>
    %270 = arith.addf %268, %269 : vector<8x32xf32>
    %271 = math.tanh %270 : vector<8x32xf32>
    %272 = arith.mulf %267, %271 : vector<8x32xf32>
    %c7_i32 = arith.constant 7 : i32
    %c8_i32_52 = arith.constant 8 : i32
    %273 = arith.muli %c7_i32, %c8_i32_52 : i32
    %274 = tpu.assume_multiple %273, 8 : i32
    %275 = arith.index_cast %274 : i32 to index
    %c0_53 = arith.constant 0 : index
    %276 = vector.load %arg7[%275, %c0_53] : memref<64x256xf32, #tpu.memory_space<vmem>>, vector<8x256xf32>
    %cst_54 = arith.constant dense<0.000000e+00> : vector<8x256xf32>
    %277 = tpu.matmul %253, %7, %cst_54 {dimension_numbers = #tpu.dot_dimension_numbers<[1], [0], [0], [1], [0, 0, 1, 1], [], []>} : vector<8x64xf32>, vector<64x256xf32>, vector<8x256xf32> -> vector<8x256xf32>
    %278 = arith.addf %276, %277 : vector<8x256xf32>
    %279 = vector.extract_strided_slice %278 {offsets = [0, 0], sizes = [8, 192], strides = [1, 1]} : vector<8x256xf32> to vector<8x192xf32>
    %280 = arith.negf %279 : vector<8x192xf32>
    %281 = math.exp %280 : vector<8x192xf32>
    %cst_55 = arith.constant 1.000000e+00 : f32
    %282 = vector.broadcast %cst_55 : f32 to vector<8x192xf32>
    %283 = arith.addf %282, %281 : vector<8x192xf32>
    %284 = arith.divf %282, %283 : vector<8x192xf32>
    %285 = vector.extract_strided_slice %278 {offsets = [0, 192], sizes = [8, 64], strides = [1, 1]} : vector<8x256xf32> to vector<8x64xf32>
    %286 = math.tanh %285 : vector<8x64xf32>
    %287 = vector.extract_strided_slice %284 {offsets = [0, 0], sizes = [8, 64], strides = [1, 1]} : vector<8x192xf32> to vector<8x64xf32>
    %288 = vector.extract_strided_slice %284 {offsets = [0, 64], sizes = [8, 64], strides = [1, 1]} : vector<8x192xf32> to vector<8x64xf32>
    %289 = vector.extract_strided_slice %284 {offsets = [0, 128], sizes = [8, 64], strides = [1, 1]} : vector<8x192xf32> to vector<8x64xf32>
    %290 = arith.mulf %288, %251 : vector<8x64xf32>
    %291 = arith.mulf %287, %286 : vector<8x64xf32>
    %292 = arith.addf %290, %291 : vector<8x64xf32>
    %293 = math.tanh %292 : vector<8x64xf32>
    %294 = arith.mulf %289, %293 : vector<8x64xf32>
    %295 = tpu.concatenate %253, %272 in 1 : vector<8x64xf32>, vector<8x32xf32> -> vector<8x96xf32>
    %cst_56 = arith.constant dense<0.000000e+00> : vector<8x128xf32>
    %296 = tpu.matmul %295, %8, %cst_56 {dimension_numbers = #tpu.dot_dimension_numbers<[1], [0], [0], [1], [0, 0, 1, 1], [], []>} : vector<8x96xf32>, vector<96x128xf32>, vector<8x128xf32> -> vector<8x128xf32>
    %297 = arith.addf %296, %11 : vector<8x128xf32>
    %298 = vector.extract_strided_slice %297 {offsets = [0, 0], sizes = [8, 96], strides = [1, 1]} : vector<8x128xf32> to vector<8x96xf32>
    %299 = arith.negf %298 : vector<8x96xf32>
    %300 = math.exp %299 : vector<8x96xf32>
    %cst_57 = arith.constant 1.000000e+00 : f32
    %301 = vector.broadcast %cst_57 : f32 to vector<8x96xf32>
    %302 = arith.addf %301, %300 : vector<8x96xf32>
    %303 = arith.divf %301, %302 : vector<8x96xf32>
    %304 = vector.extract_strided_slice %297 {offsets = [0, 96], sizes = [8, 32], strides = [1, 1]} : vector<8x128xf32> to vector<8x32xf32>
    %305 = math.tanh %304 : vector<8x32xf32>
    %306 = vector.extract_strided_slice %303 {offsets = [0, 0], sizes = [8, 32], strides = [1, 1]} : vector<8x96xf32> to vector<8x32xf32>
    %307 = vector.extract_strided_slice %303 {offsets = [0, 32], sizes = [8, 32], strides = [1, 1]} : vector<8x96xf32> to vector<8x32xf32>
    %308 = vector.extract_strided_slice %303 {offsets = [0, 64], sizes = [8, 32], strides = [1, 1]} : vector<8x96xf32> to vector<8x32xf32>
    %309 = arith.mulf %307, %270 : vector<8x32xf32>
    %310 = arith.mulf %306, %305 : vector<8x32xf32>
    %311 = arith.addf %309, %310 : vector<8x32xf32>
    %312 = math.tanh %311 : vector<8x32xf32>
    %313 = arith.mulf %308, %312 : vector<8x32xf32>
    %c7_i32_58 = arith.constant 7 : i32
    %314 = tpu.concatenate %294, %313 in 1 : vector<8x64xf32>, vector<8x32xf32> -> vector<8x96xf32>
    %cst_59 = arith.constant dense<0.000000e+00> : vector<8x128xf32>
    %315 = tpu.matmul %314, %8, %cst_59 {dimension_numbers = #tpu.dot_dimension_numbers<[1], [0], [0], [1], [0, 0, 1, 1], [], []>} : vector<8x96xf32>, vector<96x128xf32>, vector<8x128xf32> -> vector<8x128xf32>
    %316 = arith.addf %315, %11 : vector<8x128xf32>
    %317 = vector.extract_strided_slice %316 {offsets = [0, 0], sizes = [8, 96], strides = [1, 1]} : vector<8x128xf32> to vector<8x96xf32>
    %318 = arith.negf %317 : vector<8x96xf32>
    %319 = math.exp %318 : vector<8x96xf32>
    %cst_60 = arith.constant 1.000000e+00 : f32
    %320 = vector.broadcast %cst_60 : f32 to vector<8x96xf32>
    %321 = arith.addf %320, %319 : vector<8x96xf32>
    %322 = arith.divf %320, %321 : vector<8x96xf32>
    %323 = vector.extract_strided_slice %316 {offsets = [0, 96], sizes = [8, 32], strides = [1, 1]} : vector<8x128xf32> to vector<8x32xf32>
    %324 = math.tanh %323 : vector<8x32xf32>
    %325 = vector.extract_strided_slice %322 {offsets = [0, 0], sizes = [8, 32], strides = [1, 1]} : vector<8x96xf32> to vector<8x32xf32>
    %326 = vector.extract_strided_slice %322 {offsets = [0, 32], sizes = [8, 32], strides = [1, 1]} : vector<8x96xf32> to vector<8x32xf32>
    %327 = vector.extract_strided_slice %322 {offsets = [0, 64], sizes = [8, 32], strides = [1, 1]} : vector<8x96xf32> to vector<8x32xf32>
    %328 = arith.mulf %326, %311 : vector<8x32xf32>
    %329 = arith.mulf %325, %324 : vector<8x32xf32>
    %330 = arith.addf %328, %329 : vector<8x32xf32>
    %331 = math.tanh %330 : vector<8x32xf32>
    %332 = arith.mulf %327, %331 : vector<8x32xf32>
    %c0_61 = arith.constant 0 : index
    %c0_62 = arith.constant 0 : index
    %333 = vector.load %arg6[%c0_61, %c0_62] : memref<8x32xf32, #tpu.memory_space<vmem>>, vector<8x32xf32>
    tpu.vector_store %arg6[%c0_61, %c0_62], %332 {strides = array<i32>} : memref<8x32xf32, #tpu.memory_space<vmem>>, vector<8x32xf32>,
    return
  }
}

</mosaic_0001>

<bundles_post_ra>
// kernel: lstm_encoder.1
= control target key start
LH: loop header
LB: loop body
LE: loop exit
PB: predicated region body
PF: predicated region fallthrough
CT: control target
= control target key end

     0   :  { %11 = vsyncpa [#allocation4], 0  ;;  %s1797_s24 = smov [#allocation3]   ;;  %s1798_s26 = smov 128   ;;  %s2463_s0 = inlined_call_operand.vmem [shape: f32[64,4], index: 0, kind: input, shape index: {}]   ;;  %s2464_s1 = inlined_call_operand.vmem [shape: f32[4,256], index: 1, kind: input, shape index: {}]   ;;  %s2465_s2 = inlined_call_operand.vmem [shape: f32[64,256], index: 2, kind: input, shape index: {}]   ;;  %s2466_s3 = inlined_call_operand.vmem [shape: f32[1,256], index: 3, kind: input, shape index: {}]   ;;  %s2467_s4 = inlined_call_operand.hbm [shape: f32[96,128], index: 4, kind: input, shape index: {}]   ;;  %s2468_s5 = inlined_call_operand.vmem [shape: f32[1,128], index: 5, kind: input, shape index: {}]   ;;  %s2469_s6 = inlined_call_operand.vmem [shape: f32[8,32], index: 6, kind: output, shape index: {}]  }
   0x1   :  { %s24_s23 = sshll.u32 %s2467_s4, 4  ;;  %s26_s25 = sshll.u32 %s1797_s24, 4  ;;  %s25_s23 = int_to_ptr.hbm [resolvable:$true] %s24_s23  ;;  %s27_s25 = int_to_ptr.vmem [resolvable:$true] %s26_s25 }
   0x2   :  { %s1799_s27 = smov 8  }
   0x3   :  { %32 = dma.hbm_to_vmem [thread:$0]  %s25_s23, 1536, %s27_s25, [#allocation4], %s1798_s26, %s1798_s26, %s1799_s27  }
   0x4   :  { %1795 = dma.done.wait [#allocation4], 1536  }
   0x5   :  { %1796 = vsyncadd [#allocation4], 4294965760  ;;  %v47_v0 = vld [vmem:[%s2464_s1] sm:$0xff]  ;;  %vm83_vm0 = vcmask 1043456   ;;  %vm58_vm1 = vcmask 31744   ;;  %v1851_v4 = vld [vmem:[%s2465_s2 + $0x70] sm:$0xff] }
   0x6   :  { %55 = vst [vmem:[#allocation1] ss:$2 sm:$0xff] %v47_v0  ;;  %v39_v1 = vld [vmem:[%s2463_s0] sm:$0xff]  ;;  %283 = vmatpush.msra.mxu2 %v1851_v4  ;;  %v1862_v6 = vld [vmem:[%s2465_s2 + $0x50] sm:$0xff]  ;;  %v1867_v7 = vld [vmem:[%s2465_s2 + $0x78] sm:$0xff]  ;;  %vm271_vm10 = vcmask 523264  }
   0x7   :  { %v1856_v5 = vld [vmem:[%s2465_s2 + $0x60] sm:$0xff]  ;;  %303 = vmatpush.msra.mxu3 %v1867_v7  ;;  %v1876_v9 = vld [vmem:[%s2465_s2 + $0x68] sm:$0xff]  ;;  %v1887_v11 = vld [vmem:[#allocation3 + $0x50] sm:$0xff]  ;;  %vm378_vm11 = vcmask 785408   ;;  %s1801_s18 = smov 32  }
   0x8   :  { %284 = vmatpush.msra.mxu2 %v1856_v5  ;;  %v1871_v8 = vld [vmem:[#allocation3 + $0x58] sm:$0xff]  ;;  %v1892_v12 = vld [vmem:[%s2465_s2 + $0x30] sm:$0xff]  ;;  %v1933_v28 = vld [vmem:[%s2465_s2 + $0x58] sm:$0xff] }
   0x9   :  { %v1881_v10 = vld [vmem:[%s2465_s2 + $0x40] sm:$0xff]  ;;  %304 = vmatpush.msra.mxu3 %v1876_v9  ;;  %v1906_v14 = vld [vmem:[%s2465_s2 + $0x10] sm:$0xff]  ;;  %v1942_v30 = vld [vmem:[%s2465_s2 + $0x48] sm:$0xff] }
   0xa   :  { %285 = vmatpush.msra.mxu2 %v1862_v6  ;;  %v1900_v13 = vld [vmem:[%s2465_s2 + $0x20] sm:$0xff]  ;;  %v1935_v29 = vld [vmem:[#allocation3 + $0x48] sm:$0xff]  ;;  %v1944_v31 = vld [vmem:[#allocation3 + $0x40] sm:$0xff] }
   0xb   :  { %v48_v15 = vld [vmem:[%s2466_s3] sm:$0x3]  ;;  %s1800_s3 = smov 64   ;;  %305 = vmatpush.msra.mxu3 %v1933_v28  ;;  %v1953_v32 = vld [vmem:[%s2465_s2 + $0x38] sm:$0xff]  ;;  %v1961_v34 = vld [vmem:[%s2465_s2 + $0x28] sm:$0xff] }
   0xc   :  { %286 = vmatpush.msra.mxu2 %v1881_v10  ;;  %v1915_v16 = vld [vmem:[%s2465_s2] sm:$0xff]  ;;  %v1918_v17 = vperm.slane %v48_v15, 1  ;;  %v1925_v21 = vperm.slane %v48_v15, 0  ;;  %v1963_v35 = vld [vmem:[#allocation3 + $0x30] sm:$0xff]  ;;  %v1974_v38 = vld [vmem:[#allocation3 + $0x28] sm:$0xff] }
   0xd   :  { %v57_v2 = vld.sshfl [vmem:[#allocation1 + $0x8] sm:$0xff pattern:$0x75316420]  ;;  %v56_v3 = vld.sshfl [vmem:[#allocation1] sm:$0xff pattern:$0x75316420]  ;;  %306 = vmatpush.msra.mxu3 %v1942_v30 }
   0xe   :  { %1529 = vmatpush.msk.msra.mxu1 %vm83_vm0, %v57_v2  ;;  %1520 = vmatpush.msk.msra.mxu0 %vm83_vm0, %v56_v3  ;;  %v1955_v33 = vld [vmem:[#allocation3 + $0x38] sm:$0xff]  ;;  %v1972_v37 = vld [vmem:[%s2465_s2 + $0x18] sm:$0xff]  ;;  %v1983_v39 = vld [vmem:[%s2465_s2 + $0x8] sm:$0xff] }
   0xf   :  { %1530 = vmatmul.msk.f32.vlgmr.msra.gmra.mxu1 %vm58_vm1, %v39_v1  ;;  %1521 = vmatmul.msk.f32.vlgmr.msra.gmra.mxu0 %vm58_vm1, %v39_v1  ;;  %v1985_v40 = vld [vmem:[#allocation3 + $0x20] sm:$0xff]  ;;  %v1997_v43 = vld [vmem:[#allocation3 + $0x18] sm:$0xff]  ;;  %v1999_v44 = vld [vmem:[#allocation3 + $0x10] sm:$0xff] }
  0x10   :  { %642 = vmatpush.msrb.mxu0 %v1867_v7  ;;  %720 = vmatpush.msrb.mxu1 %v1871_v8  ;;  %v40_v45 = vld [vmem:[%s2463_s0 + $0x8] sm:$0xff]  ;;  %v2011_v47 = vld [vmem:[#allocation3 + $0x8] sm:$0xff] }
  0x11   :  { %287 = vmatpush.msra.mxu2 %v1892_v12  ;;  %307 = vmatpush.msra.mxu3 %v1953_v32  ;;  %v2016_v48 = vld [vmem:[#allocation3] sm:$0xff] }
  0x12   :  { %643 = vmatpush.msrb.mxu0 %v1876_v9  ;;  %721 = vmatpush.msrb.mxu1 %v1887_v11 }
  0x13   :  { %288 = vmatpush.msra.mxu2 %v1900_v13  ;;  %308 = vmatpush.msra.mxu3 %v1961_v34 }
  0x14   :  { %644 = vmatpush.msrb.mxu0 %v1933_v28  ;;  %722 = vmatpush.msrb.mxu1 %v1935_v29 }
  0x15   :  { %289 = vmatpush.msra.mxu2 %v1906_v14  ;;  %309 = vmatpush.msra.mxu3 %v1972_v37 }
  0x16   :  { %645 = vmatpush.msrb.mxu0 %v1942_v30  ;;  %723 = vmatpush.msrb.mxu1 %v1944_v31 }
  0x17   :  { %290 = vmatpush.msra.mxu2 %v1915_v16  ;;  %310 = vmatpush.msra.mxu3 %v1983_v39 }
  0x18   :  { %646 = vmatpush.msrb.mxu0 %v1953_v32  ;;  %724 = vmatpush.msrb.mxu1 %v1955_v33 }
  0x19   :  { %386 = vmatpush.msrb.mxu2 %v1871_v8  ;;  %455 = vmatpush.msrb.mxu3 %v1851_v4 }
  0x1a   :  { %725 = vmatpush.msrb.mxu1 %v1963_v35  ;;  %647 = vmatpush.msrb.mxu0 %v1961_v34 }
  0x1b   :  { %387 = vmatpush.msrb.mxu2 %v1887_v11  ;;  %1522 = vmatmul.msk.f32.gmra.mxu0 %vm58_vm1, %v40_v45 }
  0x1c   :  { %726 = vmatpush.msrb.mxu1 %v1974_v38  ;;  %648 = vmatpush.msrb.mxu0 %v1972_v37 }
  0x1d   :  { %388 = vmatpush.msrb.mxu2 %v1935_v29  ;;  %1531 = vmatmul.msk.f32.gmra.mxu1 %vm58_vm1, %v40_v45 }
  0x1e   :  { %727 = vmatpush.msrb.mxu1 %v1985_v40  ;;  %456 = vmatpush.msrb.mxu3 %v1856_v5 }
  0x1f   :  { %389 = vmatpush.msrb.mxu2 %v1944_v31  ;;  %649 = vmatpush.msrb.mxu0 %v1983_v39 }
  0x20   :  { %728 = vmatpush.msrb.mxu1 %v1997_v43  ;;  %457 = vmatpush.msrb.mxu3 %v1862_v6 }
  0x21   :  { %390 = vmatpush.msrb.mxu2 %v1955_v33  ;;  %887 = vmatpush.msra.mxu0 %v1871_v8 }
  0x22   :  { %729 = vmatpush.msrb.mxu1 %v1999_v44  ;;  %458 = vmatpush.msrb.mxu3 %v1881_v10 }
  0x23   :  { %391 = vmatpush.msrb.mxu2 %v1963_v35  ;;  %888 = vmatpush.msra.mxu0 %v1887_v11 }
  0x24   :  { %730 = vmatpush.msrb.mxu1 %v2011_v47  ;;  %459 = vmatpush.msrb.mxu3 %v1892_v12 }
  0x25   :  { %392 = vmatpush.msrb.mxu2 %v1974_v38  ;;  %889 = vmatpush.msra.mxu0 %v1935_v29 }
  0x26   :  { %731 = vmatpush.msrb.mxu1 %v2016_v48  ;;  %460 = vmatpush.msrb.mxu3 %v1900_v13 }
  0x27   :  { %393 = vmatpush.msrb.mxu2 %v1985_v40  ;;  %890 = vmatpush.msra.mxu0 %v1944_v31 }
  0x28   :  { %1123 = vmatpush.msra.mxu1 %v1851_v4  ;;  %461 = vmatpush.msrb.mxu3 %v1906_v14 }
  0x29   :  { %394 = vmatpush.msrb.mxu2 %v1997_v43  ;;  %891 = vmatpush.msra.mxu0 %v1955_v33 }
  0x2a   :  { %1124 = vmatpush.msra.mxu1 %v1856_v5  ;;  %462 = vmatpush.msrb.mxu3 %v1915_v16 }
  0x2b   :  { %395 = vmatpush.msrb.mxu2 %v1999_v44  ;;  %892 = vmatpush.msra.mxu0 %v1963_v35 }
  0x2c   :  { %1125 = vmatpush.msra.mxu1 %v1862_v6 }
  0x2d   :  { %396 = vmatpush.msrb.mxu2 %v2011_v47  ;;  %893 = vmatpush.msra.mxu0 %v1974_v38 }
  0x2e   :  { %1126 = vmatpush.msra.mxu1 %v1881_v10 }
  0x2f   :  { %397 = vmatpush.msrb.mxu2 %v2016_v48  ;;  %894 = vmatpush.msra.mxu0 %v1985_v40 }
  0x30   :  { %1127 = vmatpush.msra.mxu1 %v1892_v12 }
  0x31   :  { %895 = vmatpush.msra.mxu0 %v1997_v43 }
  0x32   :  { %1128 = vmatpush.msra.mxu1 %v1900_v13 }
  0x33   :  { %896 = vmatpush.msra.mxu0 %v1999_v44 }
  0x34   :  { %1129 = vmatpush.msra.mxu1 %v1906_v14 }
  0x35   :  { %897 = vmatpush.msra.mxu0 %v2011_v47 }
  0x36   :  { %1130 = vmatpush.msra.mxu1 %v1915_v16 }
  0x37   :  { %898 = vmatpush.msra.mxu0 %v2016_v48 }
  0x8c   :  { %v146_v18 = vpop.f32.mrf.mxu1  ;;  %v105_v22 = vpop.f32.mrf.mxu0 }
  0x8d   :  { %v147_v19 = vadd.f32 %v146_v18, %v1918_v17  ;;  %v106_v23 = vadd.f32 %v105_v22, %v1925_v21 }
  0x8f   :  { %1590 = vtanh.f32 %v147_v19  ;;  %v1538_v24 = vmul.f32 -1.442695, %v106_v23  ;;  %v1539_v25 = vmul.f32 -1.442695, %v147_v19 }
  0x91   :  { %1592 = vpow2.f32 %v1538_v24 }
  0x92   :  { %1594 = vpow2.f32 %v1539_v25 }
  0x95   :  { %v1591_v20 = vpop.eup %1590 }
  0x96   :  { %260 = vrot.lane.b32.xlu0 %v1591_v20, %s1800_s3 }
  0x97   :  { %v1593_v26 = vpop.eup %1592 }
  0x98   :  { %v1928_v27 = vadd.f32 1.0, %v1593_v26  ;;  %v1595_v36 = vpop.eup %1594 }
  0x99   :  { %v1989_v41 = vadd.f32 1.0, %v1595_v36 }
  0x9a   :  { %1596 = vrcp.f32 %v1928_v27  ;;  %vm233_vm2 = vweird.f32 %v1928_v27  ;;  %v239_v53 = vand.u32 2147483648, %v1928_v27  ;;  %v237_v55 = vand.u32 2147483647, %v1928_v27  ;;  %v149_v22 = vpop.f32.mrf.mxu1 }
  0x9b   :  { %1598 = vrcp.f32 %v1989_v41  ;;  %v254_v0 = vand.u32 2147483648, %v1989_v41  ;;  %vm248_vm7 = vweird.f32 %v1989_v41  ;;  %v252_v1 = vand.u32 2147483647, %v1989_v41 }
  0x9c   :  { %v240_v57 = vor.u32 1.1754944e-38, %v239_v53  ;;  %vm238_vm5 = vcmp.eq.f32.partialorder %v237_v55, 8.507059e+37  ;;  %v150_v23 = vadd.f32 %v149_v22, %v1918_v17 }
  0x9d   :  { %v255_v3 = vor.u32 1.1754944e-38, %v254_v0  ;;  %vm253_vm9 = vcmp.eq.f32.partialorder %v252_v1, 8.507059e+37 }
  0xa0   :  { %v1597_v42 = vpop.eup %1596 }
  0xa1   :  { %v229_v46 = vmul.f32 %v1597_v42, %v1928_v27  ;;  %v1599_v50 = vpop.eup %1598  ;;  %vm234_vm3 = vweird.f32 %v1597_v42  ;;  %v2099_v27 = vld [vmem:[%s2468_s5] ss:$0 sm:$0xff] }
  0xa2   :  { %v244_v52 = vmul.f32 %v1599_v50, %v1989_v41  ;;  %vm235_vm4 = vmor %vm233_vm2, %vm234_vm3  ;;  %vm249_vm6 = vweird.f32 %v1599_v50 }
  0xa3   :  { %v230_v49 = vsub.f32 1.0, %v229_v46  ;;  %vm250_vm8 = vmor %vm248_vm7, %vm249_vm6  ;;  %v108_v46 = vpop.f32.mrf.mxu0 }
  0xa4   :  { %v245_v56 = vsub.f32 1.0, %v244_v52 }
  0xa5   :  { %v231_v51 = vmul.f32 %v1597_v42, %v230_v49  ;;  %v109_v49 = vadd.f32 %v108_v46, %v1925_v21 }
  0xa6   :  { %v246_v59 = vmul.f32 %v1599_v50, %v245_v56 }
  0xa7   :  { %v232_v54 = vadd.f32 %v1597_v42, %v231_v51 }
  0xa8   :  { %v247_v63 = vadd.f32 %v1599_v50, %v246_v59 }
  0xa9   :  { %v236_v58 = vsel %vm235_vm4, %v1597_v42, %v232_v54 }
  0xaa   :  { %v241_v61 = vsel %vm238_vm5, %v240_v57, %v236_v58  ;;  %v251_v2 = vsel %vm250_vm8, %v1599_v50, %v247_v63 }
  0xab   :  { %v256_v18 = vsel %vm253_vm9, %v255_v3, %v251_v2 }
 0x108   :  { %v261_v60 = vpop.permute.xlu0 %260 }
 0x109   :  { %v2047_v62 = vmul.f32 %v261_v60, %v241_v61 }
 0x10b   :  { %1600 = vtanh.f32 %v2047_v62 }
 0x111   :  { %v1601_v15 = vpop.eup %1600 }
 0x112   :  { %v265_v19 = vmul.f32 %v1601_v15, %v256_v18 }
 0x114   :  { %1540 = vmatmul.msk.f32.vlgmr.msra.gmra.mxu2 %vm271_vm10, %v265_v19  ;;  %1541 = vmatmul.msk.f32.vlgmr.msra.gmra.mxu3 %vm271_vm10, %v265_v19  ;;  %v377_v20 = vsel %vm271_vm10, %v265_v19, 0.0 }
 0x115   :  { %553 = vmatpush.msra.mxu2 %v1871_v8  ;;  %475 = vmatpush.msra.mxu3 %v1867_v7 }
 0x117   :  { %554 = vmatpush.msra.mxu2 %v1887_v11  ;;  %476 = vmatpush.msra.mxu3 %v1876_v9 }
 0x119   :  { %555 = vmatpush.msra.mxu2 %v1935_v29  ;;  %477 = vmatpush.msra.mxu3 %v1933_v28 }
 0x11b   :  { %556 = vmatpush.msra.mxu2 %v1944_v31  ;;  %478 = vmatpush.msra.mxu3 %v1942_v30 }
 0x11c   :  { %1544 = vmatmul.msk.f32.vlgmr.msrb.gmra.mxu2 %vm378_vm11, %v377_v20 }
 0x11d   :  { %557 = vmatpush.msra.mxu2 %v1955_v33  ;;  %479 = vmatpush.msra.mxu3 %v1953_v32 }
 0x11f   :  { %558 = vmatpush.msra.mxu2 %v1963_v35  ;;  %480 = vmatpush.msra.mxu3 %v1961_v34 }
 0x121   :  { %559 = vmatpush.msra.mxu2 %v1974_v38  ;;  %481 = vmatpush.msra.mxu3 %v1972_v37 }
 0x123   :  { %560 = vmatpush.msra.mxu2 %v1985_v40  ;;  %482 = vmatpush.msra.mxu3 %v1983_v39 }
 0x125   :  { %561 = vmatpush.msra.mxu2 %v1997_v43 }
 0x127   :  { %562 = vmatpush.msra.mxu2 %v1999_v44 }
 0x129   :  { %563 = vmatpush.msra.mxu2 %v2011_v47 }
 0x12b   :  { %564 = vmatpush.msra.mxu2 %v2016_v48 }
 0x12d   :  { %789 = vmatpush.msrb.mxu2 %v1851_v4 }
 0x12f   :  { %790 = vmatpush.msrb.mxu2 %v1856_v5 }
 0x131   :  { %791 = vmatpush.msrb.mxu2 %v1862_v6 }
 0x133   :  { %792 = vmatpush.msrb.mxu2 %v1881_v10 }
 0x135   :  { %793 = vmatpush.msrb.mxu2 %v1892_v12 }
 0x137   :  { %794 = vmatpush.msrb.mxu2 %v1900_v13 }
 0x139   :  { %795 = vmatpush.msrb.mxu2 %v1906_v14 }
 0x13b   :  { %796 = vmatpush.msrb.mxu2 %v1915_v16 }
 0x197   :  { %v292_v24 = vpop.f32.mrf.mxu2  ;;  %v312_v25 = vpop.f32.mrf.mxu3 }
 0x198   :  { %v2093_v26 = vadd.f32 %v312_v25, %v150_v23  ;;  %v315_v50 = vadd.f32 %v292_v24, %v109_v49 }
 0x19a   :  { %1602 = vtanh.f32 %v2093_v26  ;;  %v1542_v51 = vmul.f32 -1.442695, %v315_v50 }
 0x19f   :  { %v399_v36 = vpop.f32.mrf.mxu2 }
 0x1a0   :  { %v1603_v41 = vpop.eup %1602  ;;  %v400_v42 = vadd.f32 %v2099_v27, %v399_v36 }
 0x1a1   :  { %362 = vrot.lane.b32.xlu0 %v1603_v41, %s1800_s3 }
 0x1a2   :  { %1604 = vtanh.f32 %v400_v42  ;;  %v1545_v52 = vmul.f32 -1.442695, %v400_v42 }
 0x1a3   :  { %1606 = vpow2.f32 %v1542_v51 }
 0x1a4   :  { %1608 = vpow2.f32 %v1545_v52 }
 0x1a8   :  { %v1605_v45 = vpop.eup %1604 }
 0x1a9   :  { %424 = vrot.lane.b32.xlu1 %v1605_v45, %s1801_s18  ;;  %v1607_v53 = vpop.eup %1606 }
 0x1aa   :  { %v323_v54 = vadd.f32 1.0, %v1607_v53  ;;  %v1609_v55 = vpop.eup %1608 }
 0x1ab   :  { %v405_v56 = vadd.f32 1.0, %v1609_v55 }
 0x1ac   :  { %1610 = vrcp.f32 %v323_v54  ;;  %v336_v1 = vand.u32 2147483648, %v323_v54  ;;  %vm330_vm13 = vweird.f32 %v323_v54  ;;  %v334_v2 = vand.u32 2147483647, %v323_v54 }
 0x1ad   :  { %1612 = vrcp.f32 %v405_v56  ;;  %v417_v24 = vand.u32 2147483648, %v405_v56  ;;  %vm411_vm2 = vweird.f32 %v405_v56  ;;  %v415_v25 = vand.u32 2147483647, %v405_v56 }
 0x1ae   :  { %v337_v18 = vor.u32 1.1754944e-38, %v336_v1  ;;  %vm335_vm15 = vcmp.eq.f32.partialorder %v334_v2, 8.507059e+37 }
 0x1af   :  { %v418_v41 = vor.u32 1.1754944e-38, %v417_v24  ;;  %vm416_vm4 = vcmp.eq.f32.partialorder %v415_v25, 8.507059e+37 }
 0x1b1   :  { %357 = vrot.lane.b32.xlu1 %v2047_v62, %s1800_s3 }
 0x1b2   :  { %v1611_v57 = vpop.eup %1610 }
 0x1b3   :  { %v326_v58 = vmul.f32 %v1611_v57, %v323_v54  ;;  %v1613_v60 = vpop.eup %1612  ;;  %vm331_vm12 = vweird.f32 %v1611_v57 }
 0x1b4   :  { %v407_v62 = vmul.f32 %v1613_v60, %v405_v56  ;;  %vm332_vm14 = vmor %vm330_vm13, %vm331_vm12  ;;  %vm412_vm0 = vweird.f32 %v1613_v60 }
 0x1b5   :  { %v327_v59 = vsub.f32 1.0, %v326_v58  ;;  %vm413_vm3 = vmor %vm411_vm2, %vm412_vm0  ;;  %v1543_v58 = vmul.f32 -1.442695, %v2093_v26 }
 0x1b6   :  { %v408_v0 = vsub.f32 1.0, %v407_v62 }
 0x1b7   :  { %v328_v61 = vmul.f32 %v1611_v57, %v327_v59 }
 0x1b8   :  { %v409_v15 = vmul.f32 %v1613_v60, %v408_v0 }
 0x1b9   :  { %v329_v63 = vadd.f32 %v1611_v57, %v328_v61  ;;  %v41_v61 = vld [vmem:[%s2463_s0 + $0x10] sm:$0xff] }
 0x1ba   :  { %v410_v23 = vadd.f32 %v1613_v60, %v409_v15  ;;  %1523 = vmatmul.msk.f32.gmra.mxu0 %vm58_vm1, %v41_v61  ;;  %1532 = vmatmul.msk.f32.gmra.mxu1 %vm58_vm1, %v41_v61 }
 0x1bb   :  { %v333_v3 = vsel %vm332_vm14, %v1611_v57, %v329_v63 }
 0x1bc   :  { %v338_v20 = vsel %vm335_vm15, %v337_v18, %v333_v3  ;;  %v414_v36 = vsel %vm413_vm3, %v1613_v60, %v410_v23 }
 0x1bd   :  { %v419_v45 = vsel %vm416_vm4, %v418_v41, %v414_v36 }
 0x1be   :  { %v422_v53 = vmul.f32 0.0, %v419_v45 }
 0x213   :  { %v363_v19 = vpop.permute.xlu0 %362 }
 0x214   :  { %v365_v22 = vmul.f32 %v363_v19, %v338_v20 }
 0x216   :  { %367 = vrot.lane.b32.xlu2 %v365_v22, %s1800_s3 }
 0x21b   :  { %v425_v42 = vpop.permute.xlu1 %424 }
 0x21c   :  { %v427_v46 = vmul.f32 %v425_v42, %v419_v45 }
 0x21e   :  { %429 = vrot.lane.b32.xlu2 %v427_v46, %s1801_s18 }
 0x223   :  { %v358_v49 = vpop.permute.xlu1 %357 }
 0x224   :  { %v360_v50 = vmul.f32 %v358_v49, %v338_v20 }
 0x237   :  { %v152_v41 = vpop.f32.mrf.mxu1 }
 0x238   :  { %v153_v42 = vadd.f32 %v152_v41, %v1918_v17 }
 0x270   :  { %v368_v51 = vpop.permute.xlu2 %367 }
 0x271   :  { %v2109_v52 = vadd.f32 %v368_v51, %v360_v50 }
 0x273   :  { %1614 = vtanh.f32 %v2109_v52 }
 0x278   :  { %v430_v54 = vpop.permute.xlu2 %429 }
 0x279   :  { %v1615_v55 = vpop.eup %1614  ;;  %v2112_v56 = vadd.f32 %v430_v54, %v422_v53  ;;  %v111_v54 = vpop.f32.mrf.mxu0 }
 0x27a   :  { %373 = vrot.lane.b32.xlu0 %v1615_v55, %s1800_s3  ;;  %v112_v55 = vadd.f32 %v111_v54, %v1925_v21 }
 0x27b   :  { %1616 = vtanh.f32 %v2112_v56 }
 0x27c   :  { %1618 = vpow2.f32 %v1543_v58 }
 0x281   :  { %v1617_v57 = vpop.eup %1616 }
 0x282   :  { %435 = vrot.lane.b32.xlu1 %v1617_v57, %s1801_s18  ;;  %v1619_v59 = vpop.eup %1618 }
 0x283   :  { %v324_v60 = vadd.f32 1.0, %v1619_v59 }
 0x285   :  { %1620 = vrcp.f32 %v324_v60  ;;  %v351_v3 = vand.u32 2147483648, %v324_v60  ;;  %vm345_vm6 = vweird.f32 %v324_v60  ;;  %v349_v26 = vand.u32 2147483647, %v324_v60 }
 0x287   :  { %v352_v18 = vor.u32 1.1754944e-38, %v351_v3  ;;  %vm350_vm8 = vcmp.eq.f32.partialorder %v349_v26, 8.507059e+37 }
 0x28b   :  { %v1621_v62 = vpop.eup %1620 }
 0x28c   :  { %v341_v63 = vmul.f32 %v1621_v62, %v324_v60  ;;  %vm346_vm5 = vweird.f32 %v1621_v62 }
 0x28d   :  { %vm347_vm7 = vmor %vm345_vm6, %vm346_vm5 }
 0x28e   :  { %v342_v0 = vsub.f32 1.0, %v341_v63 }
 0x290   :  { %v343_v1 = vmul.f32 %v1621_v62, %v342_v0 }
 0x292   :  { %v344_v2 = vadd.f32 %v1621_v62, %v343_v1 }
 0x294   :  { %v348_v15 = vsel %vm347_vm7, %v1621_v62, %v344_v2 }
 0x295   :  { %v353_v19 = vsel %vm350_vm8, %v352_v18, %v348_v15 }
 0x2ec   :  { %v374_v20 = vpop.permute.xlu0 %373 }
 0x2ed   :  { %v376_v22 = vmul.f32 %v374_v20, %v353_v19 }
 0x2ef   :  { %1546 = vmatmul.msk.f32.vlgmr.msrb.gmra.mxu3 %vm271_vm10, %v376_v22 }
 0x2f0   :  { %622 = vmatpush.msrb.mxu3 %v1851_v4 }
 0x2f2   :  { %623 = vmatpush.msrb.mxu3 %v1856_v5 }
 0x2f4   :  { %v436_v23 = vpop.permute.xlu1 %435  ;;  %624 = vmatpush.msrb.mxu3 %v1862_v6 }
 0x2f5   :  { %v438_v24 = vmul.f32 %v436_v23, %v419_v45 }
 0x2f6   :  { %625 = vmatpush.msrb.mxu3 %v1881_v10 }
 0x2f7   :  { %v545_v25 = vsel %vm271_vm10, %v376_v22, %v438_v24  ;;  %1547 = vmatmul.msk.f32.vlgmr.msra.gmra.mxu3 %vm271_vm10, %v376_v22 }
 0x2f8   :  { %1550 = vmatmul.msk.f32.vlgmr.msra.gmra.mxu2 %vm378_vm11, %v545_v25  ;;  %626 = vmatpush.msrb.mxu3 %v1892_v12 }
 0x2f9   :  { %956 = vmatpush.msra.mxu2 %v1851_v4 }
 0x2fa   :  { %627 = vmatpush.msrb.mxu3 %v1900_v13 }
 0x2fb   :  { %957 = vmatpush.msra.mxu2 %v1856_v5 }
 0x2fc   :  { %628 = vmatpush.msrb.mxu3 %v1906_v14 }
 0x2fd   :  { %958 = vmatpush.msra.mxu2 %v1862_v6 }
 0x2fe   :  { %629 = vmatpush.msrb.mxu3 %v1915_v16 }
 0x2ff   :  { %959 = vmatpush.msra.mxu2 %v1881_v10 }
 0x300   :  { %809 = vmatpush.msra.mxu3 %v1867_v7 }
 0x301   :  { %960 = vmatpush.msra.mxu2 %v1892_v12 }
 0x302   :  { %810 = vmatpush.msra.mxu3 %v1876_v9 }
 0x303   :  { %961 = vmatpush.msra.mxu2 %v1900_v13 }
 0x304   :  { %811 = vmatpush.msra.mxu3 %v1933_v28 }
 0x305   :  { %962 = vmatpush.msra.mxu2 %v1906_v14 }
 0x306   :  { %812 = vmatpush.msra.mxu3 %v1942_v30 }
 0x307   :  { %963 = vmatpush.msra.mxu2 %v1915_v16 }
 0x308   :  { %813 = vmatpush.msra.mxu3 %v1953_v32 }
 0x30a   :  { %814 = vmatpush.msra.mxu3 %v1961_v34 }
 0x30c   :  { %815 = vmatpush.msra.mxu3 %v1972_v37 }
 0x30e   :  { %816 = vmatpush.msra.mxu3 %v1983_v39 }
 0x372   :  { %v464_v36 = vpop.f32.mrf.mxu3 }
 0x373   :  { %v487_v57 = vadd.f32 %v464_v36, %v112_v55 }
 0x375   :  { %v1548_v58 = vmul.f32 -1.442695, %v487_v57 }
 0x37a   :  { %v484_v45 = vpop.f32.mrf.mxu3 }
 0x37b   :  { %v2152_v46 = vadd.f32 %v484_v45, %v153_v42  ;;  %v566_v49 = vpop.f32.mrf.mxu2 }
 0x37c   :  { %v567_v50 = vadd.f32 %v2099_v27, %v566_v49 }
 0x37d   :  { %1622 = vtanh.f32 %v2152_v46 }
 0x37e   :  { %1624 = vtanh.f32 %v567_v50  ;;  %v1551_v62 = vmul.f32 -1.442695, %v567_v50 }
 0x37f   :  { %1626 = vpow2.f32 %v1548_v58  ;;  %v42_v58 = vld [vmem:[%s2463_s0 + $0x18] sm:$0xff] }
 0x380   :  { %1524 = vmatmul.msk.f32.gmra.mxu0 %vm58_vm1, %v42_v58  ;;  %1533 = vmatmul.msk.f32.gmra.mxu1 %vm58_vm1, %v42_v58 }
 0x383   :  { %v1623_v51 = vpop.eup %1622 }
 0x384   :  { %v1625_v53 = vpop.eup %1624  ;;  %530 = vrot.lane.b32.xlu2 %v1623_v51, %s1800_s3 }
 0x385   :  { %591 = vrot.lane.b32.xlu0 %v1625_v53, %s1801_s18  ;;  %v1627_v59 = vpop.eup %1626 }
 0x386   :  { %v495_v60 = vadd.f32 1.0, %v1627_v59  ;;  %v43_v59 = vld [vmem:[%s2463_s0 + $0x20] sm:$0xff] }
 0x388   :  { %1628 = vrcp.f32 %v495_v60  ;;  %v508_v15 = vand.u32 2147483648, %v495_v60  ;;  %vm502_vm12 = vweird.f32 %v495_v60  ;;  %v506_v18 = vand.u32 2147483647, %v495_v60  ;;  %1525 = vmatmul.msk.f32.gmra.mxu0 %vm58_vm1, %v43_v59  ;;  %1534 = vmatmul.msk.f32.gmra.mxu1 %vm58_vm1, %v43_v59 }
 0x389   :  { %1630 = vpow2.f32 %v1551_v62 }
 0x38a   :  { %v509_v20 = vor.u32 1.1754944e-38, %v508_v15  ;;  %vm507_vm14 = vcmp.eq.f32.partialorder %v506_v18, 8.507059e+37  ;;  %v1549_v15 = vmul.f32 -1.442695, %v2152_v46 }
 0x38e   :  { %v1629_v61 = vpop.eup %1628 }
 0x38f   :  { %v498_v63 = vmul.f32 %v1629_v61, %v495_v60  ;;  %v1631_v2 = vpop.eup %1630  ;;  %vm503_vm9 = vweird.f32 %v1629_v61  ;;  %v44_v60 = vld [vmem:[%s2463_s0 + $0x28] sm:$0xff] }
 0x390   :  { %v572_v3 = vadd.f32 1.0, %v1631_v2  ;;  %vm504_vm13 = vmor %vm502_vm12, %vm503_vm9  ;;  %1526 = vmatmul.msk.f32.gmra.mxu0 %vm58_vm1, %v44_v60  ;;  %1535 = vmatmul.msk.f32.gmra.mxu1 %vm58_vm1, %v44_v60  ;;  %v45_v2 = vld [vmem:[%s2463_s0 + $0x30] sm:$0xff] }
 0x391   :  { %v499_v0 = vsub.f32 1.0, %v498_v63 }
 0x392   :  { %1632 = vrcp.f32 %v572_v3  ;;  %v584_v49 = vand.u32 2147483648, %v572_v3  ;;  %vm578_vm0 = vweird.f32 %v572_v3  ;;  %v582_v50 = vand.u32 2147483647, %v572_v3 }
 0x393   :  { %v500_v1 = vmul.f32 %v1629_v61, %v499_v0 }
 0x394   :  { %v585_v53 = vor.u32 1.1754944e-38, %v584_v49  ;;  %vm583_vm3 = vcmp.eq.f32.partialorder %v582_v50, 8.507059e+37 }
 0x395   :  { %v501_v26 = vadd.f32 %v1629_v61, %v500_v1 }
 0x397   :  { %v505_v19 = vsel %vm504_vm13, %v1629_v61, %v501_v26 }
 0x398   :  { %v510_v22 = vsel %vm507_vm14, %v509_v20, %v505_v19  ;;  %v1633_v25 = vpop.eup %1632  ;;  %1527 = vmatmul.msk.f32.gmra.mxu0 %vm58_vm1, %v45_v2  ;;  %1536 = vmatmul.msk.f32.gmra.mxu1 %vm58_vm1, %v45_v2 }
 0x399   :  { %v574_v36 = vmul.f32 %v1633_v25, %v572_v3  ;;  %vm579_vm15 = vweird.f32 %v1633_v25  ;;  %v528_v61 = vmul.f32 %v510_v22, %v2109_v52 }
 0x39a   :  { %vm580_vm2 = vmor %vm578_vm0, %vm579_vm15 }
 0x39b   :  { %v575_v41 = vsub.f32 1.0, %v574_v36 }
 0x39d   :  { %v576_v42 = vmul.f32 %v1633_v25, %v575_v41 }
 0x39f   :  { %v577_v45 = vadd.f32 %v1633_v25, %v576_v42 }
 0x3a1   :  { %v581_v51 = vsel %vm580_vm2, %v1633_v25, %v577_v45 }
 0x3a2   :  { %v586_v55 = vsel %vm583_vm3, %v585_v53, %v581_v51 }
 0x3a3   :  { %v589_v63 = vmul.f32 %v586_v55, %v2112_v56  ;;  %v46_v56 = vld [vmem:[%s2463_s0 + $0x38] sm:$0xff] }
 0x3a4   :  { %1528 = vmatmul.msk.f32.gmra.mxu0 %vm58_vm1, %v46_v56  ;;  %1537 = vmatmul.msk.f32.gmra.mxu1 %vm58_vm1, %v46_v56 }
 0x3de   :  { %v531_v23 = vpop.permute.xlu2 %530 }
 0x3df   :  { %v533_v24 = vmul.f32 %v531_v23, %v510_v22 }
 0x3e1   :  { %535 = vrot.lane.b32.xlu1 %v533_v24, %s1800_s3 }
 0x3f7   :  { %v592_v54 = vpop.permute.xlu0 %591 }
 0x3f8   :  { %v594_v57 = vmul.f32 %v592_v54, %v586_v55 }
 0x3fa   :  { %596 = vrot.lane.b32.xlu2 %v594_v57, %s1801_s18 }
 0x453   :  { %v536_v62 = vpop.permute.xlu1 %535 }
 0x454   :  { %v2178_v0 = vadd.f32 %v536_v62, %v528_v61  ;;  %v597_v1 = vpop.permute.xlu2 %596 }
 0x455   :  { %v2183_v3 = vadd.f32 %v597_v1, %v589_v63 }
 0x456   :  { %1634 = vtanh.f32 %v2178_v0 }
 0x457   :  { %1636 = vtanh.f32 %v2183_v3 }
 0x458   :  { %1638 = vpow2.f32 %v1549_v15 }
 0x45c   :  { %v1635_v52 = vpop.eup %1634 }
 0x45d   :  { %v1637_v26 = vpop.eup %1636  ;;  %541 = vrot.lane.b32.xlu0 %v1635_v52, %s1800_s3 }
 0x45e   :  { %602 = vrot.lane.b32.xlu1 %v1637_v26, %s1801_s18  ;;  %v1639_v18 = vpop.eup %1638 }
 0x45f   :  { %v496_v19 = vadd.f32 1.0, %v1639_v18 }
 0x461   :  { %1640 = vrcp.f32 %v496_v19  ;;  %v523_v36 = vand.u32 2147483648, %v496_v19  ;;  %vm517_vm5 = vweird.f32 %v496_v19  ;;  %v521_v41 = vand.u32 2147483647, %v496_v19 }
 0x463   :  { %v524_v45 = vor.u32 1.1754944e-38, %v523_v36  ;;  %vm522_vm7 = vcmp.eq.f32.partialorder %v521_v41, 8.507059e+37 }
 0x467   :  { %v1641_v20 = vpop.eup %1640 }
 0x468   :  { %v513_v22 = vmul.f32 %v1641_v20, %v496_v19  ;;  %vm518_vm4 = vweird.f32 %v1641_v20 }
 0x469   :  { %vm519_vm6 = vmor %vm517_vm5, %vm518_vm4 }
 0x46a   :  { %v514_v23 = vsub.f32 1.0, %v513_v22 }
 0x46c   :  { %v515_v24 = vmul.f32 %v1641_v20, %v514_v23 }
 0x46e   :  { %v516_v25 = vadd.f32 %v1641_v20, %v515_v24 }
 0x470   :  { %v520_v42 = vsel %vm519_vm6, %v1641_v20, %v516_v25 }
 0x471   :  { %v525_v50 = vsel %vm522_vm7, %v524_v45, %v520_v42 }
 0x4cf   :  { %v542_v49 = vpop.permute.xlu0 %541 }
 0x4d0   :  { %v544_v46 = vmul.f32 %v542_v49, %v525_v50  ;;  %v603_v51 = vpop.permute.xlu1 %602 }
 0x4d1   :  { %v605_v53 = vmul.f32 %v603_v51, %v586_v55 }
 0x4d2   :  { %1552 = vmatmul.msk.f32.vlgmr.msrb.gmra.mxu3 %vm271_vm10, %v544_v46  ;;  %1553 = vmatmul.msk.f32.vlgmr.msrb.gmra.mxu0 %vm271_vm10, %v544_v46 }
 0x4d3   :  { %v712_v54 = vsel %vm271_vm10, %v544_v46, %v605_v53  ;;  %1054 = vmatpush.msrb.mxu3 %v1871_v8  ;;  %1143 = vmatpush.msrb.mxu0 %v1867_v7 }
 0x4d4   :  { %1556 = vmatmul.msk.f32.vlgmr.msrb.gmra.mxu1 %vm378_vm11, %v712_v54 }
 0x4d5   :  { %1055 = vmatpush.msrb.mxu3 %v1887_v11  ;;  %1144 = vmatpush.msrb.mxu0 %v1876_v9 }
 0x4d6   :  { %1290 = vmatpush.msrb.mxu1 %v1851_v4  ;;  %v114_v4 = vpop.f32.mrf.mxu0 }
 0x4d7   :  { %1056 = vmatpush.msrb.mxu3 %v1935_v29  ;;  %1145 = vmatpush.msrb.mxu0 %v1933_v28 }
 0x4d8   :  { %1291 = vmatpush.msrb.mxu1 %v1856_v5  ;;  %v155_v5 = vpop.f32.mrf.mxu1 }
 0x4d9   :  { %1057 = vmatpush.msrb.mxu3 %v1944_v31  ;;  %1146 = vmatpush.msrb.mxu0 %v1942_v30 }
 0x4da   :  { %1292 = vmatpush.msrb.mxu1 %v1862_v6 }
 0x4db   :  { %1058 = vmatpush.msrb.mxu3 %v1955_v33  ;;  %1147 = vmatpush.msrb.mxu0 %v1953_v32 }
 0x4dc   :  { %1293 = vmatpush.msrb.mxu1 %v1881_v10 }
 0x4dd   :  { %1059 = vmatpush.msrb.mxu3 %v1963_v35  ;;  %1148 = vmatpush.msrb.mxu0 %v1961_v34  ;;  %v115_v34 = vadd.f32 %v114_v4, %v1925_v21 }
 0x4de   :  { %1294 = vmatpush.msrb.mxu1 %v1892_v12  ;;  %v2229_v6 = vpop.f32.mrf.mxu0 }
 0x4df   :  { %1060 = vmatpush.msrb.mxu3 %v1974_v38  ;;  %1149 = vmatpush.msrb.mxu0 %v1972_v37 }
 0x4e0   :  { %1295 = vmatpush.msrb.mxu1 %v1900_v13  ;;  %v2231_v7 = vpop.f32.mrf.mxu1 }
 0x4e1   :  { %1061 = vmatpush.msrb.mxu3 %v1985_v40  ;;  %1150 = vmatpush.msrb.mxu0 %v1983_v39 }
 0x4e2   :  { %1296 = vmatpush.msrb.mxu1 %v1906_v14  ;;  %v156_v14 = vadd.f32 %v155_v5, %v1918_v17 }
 0x4e3   :  { %1062 = vmatpush.msrb.mxu3 %v1997_v43 }
 0x4e4   :  { %1297 = vmatpush.msrb.mxu1 %v1915_v16 }
 0x4e5   :  { %1063 = vmatpush.msrb.mxu3 %v1999_v44 }
 0x4e6   :  { %v2233_v8 = vpop.f32.mrf.mxu0 }
 0x4e7   :  { %1064 = vmatpush.msrb.mxu3 %v2011_v47 }
 0x4e8   :  { %v2235_v9 = vpop.f32.mrf.mxu1 }
 0x4e9   :  { %1065 = vmatpush.msrb.mxu3 %v2016_v48 }
 0x4ee   :  { %v2237_v10 = vpop.f32.mrf.mxu0 }
 0x4f0   :  { %v2239_v11 = vpop.f32.mrf.mxu1 }
 0x4f6   :  { %v2241_v12 = vpop.f32.mrf.mxu0 }
 0x4f8   :  { %v2243_v13 = vpop.f32.mrf.mxu1 }
 0x54f   :  { %v651_v16 = vpop.f32.mrf.mxu0 }
 0x550   :  { %v2246_v28 = vadd.f32 %v651_v16, %v156_v14 }
 0x551   :  { %v733_v29 = vpop.f32.mrf.mxu1 }
 0x552   :  { %1642 = vtanh.f32 %v2246_v28  ;;  %v734_v30 = vadd.f32 %v2099_v27, %v733_v29 }
 0x554   :  { %1644 = vtanh.f32 %v734_v30  ;;  %v1557_v44 = vmul.f32 -1.442695, %v734_v30 }
 0x555   :  { %v631_v33 = vpop.f32.mrf.mxu3 }
 0x556   :  { %v654_v35 = vadd.f32 %v631_v33, %v115_v34 }
 0x558   :  { %v1643_v31 = vpop.eup %1642  ;;  %v1554_v37 = vmul.f32 -1.442695, %v654_v35 }
 0x559   :  { %697 = vrot.lane.b32.xlu2 %v1643_v31, %s1800_s3 }
 0x55a   :  { %v1645_v32 = vpop.eup %1644  ;;  %1646 = vpow2.f32 %v1554_v37 }
 0x55b   :  { %758 = vrot.lane.b32.xlu0 %v1645_v32, %s1801_s18 }
 0x560   :  { %v1647_v38 = vpop.eup %1646 }
 0x561   :  { %v662_v39 = vadd.f32 1.0, %v1647_v38 }
 0x563   :  { %1648 = vrcp.f32 %v662_v39  ;;  %v675_v60 = vand.u32 2147483648, %v662_v39  ;;  %vm669_vm8 = vweird.f32 %v662_v39  ;;  %v673_v62 = vand.u32 2147483647, %v662_v39 }
 0x564   :  { %1650 = vpow2.f32 %v1557_v44 }
 0x565   :  { %v676_v1 = vor.u32 1.1754944e-38, %v675_v60  ;;  %vm674_vm12 = vcmp.eq.f32.partialorder %v673_v62, 8.507059e+37  ;;  %v2285_v60 = vld [vmem:[#allocation3 + $0x50] sm:$0xff]  ;;  %v2291_v62 = vld [vmem:[#allocation3 + $0x48] sm:$0xff] }
 0x569   :  { %v1649_v40 = vpop.eup %1648 }
 0x56a   :  { %v665_v43 = vmul.f32 %v1649_v40, %v662_v39  ;;  %v1651_v58 = vpop.eup %1650  ;;  %vm670_vm1 = vweird.f32 %v1649_v40 }
 0x56b   :  { %v739_v61 = vadd.f32 1.0, %v1651_v58  ;;  %vm671_vm9 = vmor %vm669_vm8, %vm670_vm1  ;;  %v2279_v58 = vld [vmem:[#allocation3 + $0x58] sm:$0xff] }
 0x56c   :  { %v666_v55 = vsub.f32 1.0, %v665_v43  ;;  %v1750_v43 = vld [vmem:[%s2465_s2 + $0x78] sm:$0xff] }
 0x56d   :  { %1652 = vrcp.f32 %v739_v61  ;;  %v751_v22 = vand.u32 2147483648, %v739_v61  ;;  %vm745_vm14 = vweird.f32 %v739_v61  ;;  %v749_v23 = vand.u32 2147483647, %v739_v61 }
 0x56e   :  { %v667_v57 = vmul.f32 %v1649_v40, %v666_v55  ;;  %v1751_v55 = vld [vmem:[%s2465_s2 + $0x68] sm:$0xff] }
 0x56f   :  { %v752_v25 = vor.u32 1.1754944e-38, %v751_v22  ;;  %vm750_vm0 = vcmp.eq.f32.partialorder %v749_v23, 8.507059e+37  ;;  %v159_v23 = vadd.f32 %v2231_v7, %v1918_v17 }
 0x570   :  { %v668_v59 = vadd.f32 %v1649_v40, %v667_v57  ;;  %v1752_v57 = vld [vmem:[%s2465_s2 + $0x58] sm:$0xff] }
 0x572   :  { %v672_v63 = vsel %vm671_vm9, %v1649_v40, %v668_v59  ;;  %v1754_v59 = vld [vmem:[%s2465_s2 + $0x48] sm:$0xff] }
 0x573   :  { %v677_v52 = vsel %vm674_vm12, %v676_v1, %v672_v63  ;;  %v1653_v26 = vpop.eup %1652  ;;  %v1758_v63 = vld [vmem:[%s2465_s2 + $0x28] sm:$0xff] }
 0x574   :  { %v741_v15 = vmul.f32 %v1653_v26, %v739_v61  ;;  %vm746_vm13 = vweird.f32 %v1653_v26  ;;  %v695_v45 = vmul.f32 %v677_v52, %v2178_v0  ;;  %v1555_v0 = vmul.f32 -1.442695, %v2246_v28  ;;  %v1756_v61 = vld [vmem:[%s2465_s2 + $0x38] sm:$0xff]  ;;  %v2297_v1 = vld [vmem:[#allocation3 + $0x40] sm:$0xff] }
 0x575   :  { %vm747_vm15 = vmor %vm745_vm14, %vm746_vm13 }
 0x576   :  { %v742_v18 = vsub.f32 1.0, %v741_v15  ;;  %v2312_v15 = vld [vmem:[#allocation3 + $0x28] sm:$0xff] }
 0x578   :  { %v743_v19 = vmul.f32 %v1653_v26, %v742_v18  ;;  %v2315_v18 = vld [vmem:[#allocation3 + $0x20] sm:$0xff] }
 0x57a   :  { %v744_v20 = vadd.f32 %v1653_v26, %v743_v19  ;;  %v2318_v19 = vld [vmem:[#allocation3 + $0x18] sm:$0xff] }
 0x57c   :  { %v748_v24 = vsel %vm747_vm15, %v1653_v26, %v744_v20  ;;  %v2309_v26 = vld [vmem:[#allocation3 + $0x30] sm:$0xff] }
 0x57d   :  { %v753_v41 = vsel %vm750_vm0, %v752_v25, %v748_v24  ;;  %v2321_v20 = vld [vmem:[#allocation3 + $0x10] sm:$0xff] }
 0x57e   :  { %v756_v46 = vmul.f32 %v753_v41, %v2183_v3 }
 0x5b3   :  { %v698_v2 = vpop.permute.xlu2 %697 }
 0x5b4   :  { %v700_v56 = vmul.f32 %v698_v2, %v677_v52  ;;  %v1760_v2 = vld [vmem:[%s2465_s2 + $0x18] sm:$0xff]  ;;  %v2303_v52 = vld [vmem:[#allocation3 + $0x38] sm:$0xff] }
 0x5b6   :  { %702 = vrot.lane.b32.xlu1 %v700_v56, %s1800_s3  ;;  %v1762_v56 = vld [vmem:[%s2465_s2 + $0x8] sm:$0xff] }
 0x5cd   :  { %v759_v36 = vpop.permute.xlu0 %758 }
 0x5ce   :  { %v761_v42 = vmul.f32 %v759_v36, %v753_v41 }
 0x5d0   :  { %763 = vrot.lane.b32.xlu2 %v761_v42, %s1801_s18 }
 0x628   :  { %v703_v49 = vpop.permute.xlu1 %702 }
 0x629   :  { %v2256_v50 = vadd.f32 %v703_v49, %v695_v45 }
 0x62a   :  { %v764_v51 = vpop.permute.xlu2 %763 }
 0x62b   :  { %1654 = vtanh.f32 %v2256_v50  ;;  %v2260_v53 = vadd.f32 %v764_v51, %v756_v46 }
 0x62d   :  { %1656 = vtanh.f32 %v2260_v53 }
 0x62e   :  { %1658 = vpow2.f32 %v1555_v0 }
 0x631   :  { %v1655_v54 = vpop.eup %1654 }
 0x632   :  { %708 = vrot.lane.b32.xlu0 %v1655_v54, %s1800_s3 }
 0x633   :  { %v1657_v4 = vpop.eup %1656 }
 0x634   :  { %769 = vrot.lane.b32.xlu1 %v1657_v4, %s1801_s18  ;;  %v1659_v5 = vpop.eup %1658 }
 0x635   :  { %v663_v14 = vadd.f32 1.0, %v1659_v5 }
 0x637   :  { %1660 = vrcp.f32 %v663_v14  ;;  %v690_v32 = vand.u32 2147483648, %v663_v14  ;;  %vm684_vm3 = vweird.f32 %v663_v14  ;;  %v688_v33 = vand.u32 2147483647, %v663_v14 }
 0x639   :  { %v691_v35 = vor.u32 1.1754944e-38, %v690_v32  ;;  %vm689_vm5 = vcmp.eq.f32.partialorder %v688_v33, 8.507059e+37 }
 0x63d   :  { %v1661_v3 = vpop.eup %1660 }
 0x63e   :  { %v680_v16 = vmul.f32 %v1661_v3, %v663_v14  ;;  %vm685_vm2 = vweird.f32 %v1661_v3 }
 0x63f   :  { %vm686_vm4 = vmor %vm684_vm3, %vm685_vm2 }
 0x640   :  { %v681_v29 = vsub.f32 1.0, %v680_v16 }
 0x642   :  { %v682_v30 = vmul.f32 %v1661_v3, %v681_v29 }
 0x644   :  { %v683_v31 = vadd.f32 %v1661_v3, %v682_v30 }
 0x646   :  { %v687_v34 = vsel %vm686_vm4, %v1661_v3, %v683_v31 }
 0x647   :  { %v692_v37 = vsel %vm689_vm5, %v691_v35, %v687_v34 }
 0x6a4   :  { %v709_v38 = vpop.permute.xlu0 %708 }
 0x6a5   :  { %v711_v28 = vmul.f32 %v709_v38, %v692_v37 }
 0x6a6   :  { %v770_v39 = vpop.permute.xlu1 %769 }
 0x6a7   :  { %1558 = vmatmul.msk.f32.vlgmr.msrb.gmra.mxu2 %vm271_vm10, %v711_v28  ;;  %1559 = vmatmul.msk.f32.vlgmr.msra.gmra.mxu3 %vm271_vm10, %v711_v28  ;;  %v772_v40 = vmul.f32 %v770_v39, %v753_v41 }
 0x6a8   :  { %976 = vmatpush.msrb.mxu2 %v1750_v43  ;;  %1310 = vmatpush.msra.mxu3 %v1750_v43 }
 0x6a9   :  { %v879_v44 = vsel %vm271_vm10, %v711_v28, %v772_v40 }
 0x6aa   :  { %977 = vmatpush.msrb.mxu2 %v1751_v55  ;;  %1311 = vmatpush.msra.mxu3 %v1751_v55 }
 0x6ab   :  { %1562 = vmatmul.msk.f32.vlgmr.msra.gmra.mxu0 %vm378_vm11, %v879_v44 }
 0x6ac   :  { %978 = vmatpush.msrb.mxu2 %v1752_v57  ;;  %1388 = vmatpush.msra.mxu0 %v2279_v58 }
 0x6ad   :  { %1312 = vmatpush.msra.mxu3 %v1752_v57 }
 0x6ae   :  { %979 = vmatpush.msrb.mxu2 %v1754_v59  ;;  %1389 = vmatpush.msra.mxu0 %v2285_v60 }
 0x6af   :  { %1313 = vmatpush.msra.mxu3 %v1754_v59 }
 0x6b0   :  { %980 = vmatpush.msrb.mxu2 %v1756_v61  ;;  %1390 = vmatpush.msra.mxu0 %v2291_v62 }
 0x6b1   :  { %1314 = vmatpush.msra.mxu3 %v1756_v61 }
 0x6b2   :  { %981 = vmatpush.msrb.mxu2 %v1758_v63  ;;  %1391 = vmatpush.msra.mxu0 %v2297_v1 }
 0x6b3   :  { %1315 = vmatpush.msra.mxu3 %v1758_v63 }
 0x6b4   :  { %982 = vmatpush.msrb.mxu2 %v1760_v2  ;;  %1392 = vmatpush.msra.mxu0 %v2303_v52 }
 0x6b5   :  { %1316 = vmatpush.msra.mxu3 %v1760_v2 }
 0x6b6   :  { %983 = vmatpush.msrb.mxu2 %v1762_v56  ;;  %1393 = vmatpush.msra.mxu0 %v2309_v26 }
 0x6b7   :  { %1317 = vmatpush.msra.mxu3 %v1762_v56 }
 0x6b8   :  { %1394 = vmatpush.msra.mxu0 %v2312_v15 }
 0x6ba   :  { %1395 = vmatpush.msra.mxu0 %v2315_v18 }
 0x6bc   :  { %1396 = vmatpush.msra.mxu0 %v2318_v19 }
 0x6be   :  { %1397 = vmatpush.msra.mxu0 %v2321_v20 }
 0x6c0   :  { %1398 = vmatpush.msra.mxu0 %v2011_v47 }
 0x6c2   :  { %1399 = vmatpush.msra.mxu0 %v2016_v48  ;;  %v118_v48 = vadd.f32 %v2229_v6, %v1925_v21 }
 0x728   :  { %v900_v22 = vpop.f32.mrf.mxu0 }
 0x729   :  { %v901_v24 = vadd.f32 %v2099_v27, %v900_v22 }
 0x72a   :  { %v818_v25 = vpop.f32.mrf.mxu3  ;;  %v798_v47 = vpop.f32.mrf.mxu2 }
 0x72b   :  { %1662 = vtanh.f32 %v901_v24  ;;  %v2329_v36 = vadd.f32 %v818_v25, %v159_v23  ;;  %v821_v45 = vadd.f32 %v798_v47, %v118_v48  ;;  %v1563_v46 = vmul.f32 -1.442695, %v901_v24 }
 0x72d   :  { %1664 = vtanh.f32 %v2329_v36  ;;  %v1560_v7 = vmul.f32 -1.442695, %v821_v45 }
 0x72f   :  { %1666 = vpow2.f32 %v1560_v7 }
 0x731   :  { %v1663_v41 = vpop.eup %1662 }
 0x732   :  { %925 = vrot.lane.b32.xlu0 %v1663_v41, %s1801_s18 }
 0x733   :  { %v1665_v42 = vpop.eup %1664 }
 0x734   :  { %864 = vrot.lane.b32.xlu2 %v1665_v42, %s1800_s3 }
 0x735   :  { %v1667_v27 = vpop.eup %1666 }
 0x736   :  { %v829_v49 = vadd.f32 1.0, %v1667_v27 }
 0x738   :  { %1668 = vrcp.f32 %v829_v49  ;;  %v842_v16 = vand.u32 2147483648, %v829_v49  ;;  %vm836_vm7 = vweird.f32 %v829_v49  ;;  %v840_v6 = vand.u32 2147483647, %v829_v49 }
 0x739   :  { %1670 = vpow2.f32 %v1563_v46 }
 0x73a   :  { %v843_v30 = vor.u32 1.1754944e-38, %v842_v16  ;;  %vm841_vm8 = vcmp.eq.f32.partialorder %v840_v6, 8.507059e+37  ;;  %v2366_v16 = vld [vmem:[#allocation3] sm:$0xff]  ;;  %v121_v6 = vadd.f32 %v2233_v8, %v1925_v21 }
 0x73e   :  { %v1669_v51 = vpop.eup %1668 }
 0x73f   :  { %v832_v54 = vmul.f32 %v1669_v51, %v829_v49  ;;  %v1671_v0 = vpop.eup %1670  ;;  %vm837_vm6 = vweird.f32 %v1669_v51 }
 0x740   :  { %v906_v5 = vadd.f32 1.0, %v1671_v0  ;;  %vm838_vm1 = vmor %vm836_vm7, %vm837_vm6 }
 0x741   :  { %v833_v4 = vsub.f32 1.0, %v832_v54 }
 0x742   :  { %1672 = vrcp.f32 %v906_v5  ;;  %v918_v39 = vand.u32 2147483648, %v906_v5  ;;  %vm912_vm12 = vweird.f32 %v906_v5  ;;  %v916_v40 = vand.u32 2147483647, %v906_v5 }
 0x743   :  { %v834_v14 = vmul.f32 %v1669_v51, %v833_v4 }
 0x744   :  { %v919_v44 = vor.u32 1.1754944e-38, %v918_v39  ;;  %vm917_vm14 = vcmp.eq.f32.partialorder %v916_v40, 8.507059e+37 }
 0x745   :  { %v835_v3 = vadd.f32 %v1669_v51, %v834_v14 }
 0x747   :  { %v839_v29 = vsel %vm838_vm1, %v1669_v51, %v835_v3  ;;  %v2363_v3 = vld [vmem:[#allocation3 + $0x8] sm:$0xff] }
 0x748   :  { %v1673_v31 = vpop.eup %1672  ;;  %v844_v33 = vsel %vm841_vm8, %v843_v30, %v839_v29 }
 0x749   :  { %v908_v35 = vmul.f32 %v1673_v31, %v906_v5  ;;  %vm913_vm9 = vweird.f32 %v1673_v31  ;;  %v862_v56 = vmul.f32 %v844_v33, %v2256_v50 }
 0x74a   :  { %vm914_vm13 = vmor %vm912_vm12, %vm913_vm9 }
 0x74b   :  { %v909_v37 = vsub.f32 1.0, %v908_v35 }
 0x74d   :  { %v910_v38 = vmul.f32 %v1673_v31, %v909_v37 }
 0x74f   :  { %v911_v28 = vadd.f32 %v1673_v31, %v910_v38 }
 0x751   :  { %v915_v43 = vsel %vm914_vm13, %v1673_v31, %v911_v28 }
 0x752   :  { %v920_v57 = vsel %vm917_vm14, %v919_v44, %v915_v43 }
 0x753   :  { %v923_v61 = vmul.f32 %v920_v57, %v2260_v53  ;;  %v1561_v53 = vmul.f32 -1.442695, %v2329_v36 }
 0x78e   :  { %v865_v32 = vpop.permute.xlu2 %864 }
 0x78f   :  { %v867_v34 = vmul.f32 %v865_v32, %v844_v33  ;;  %v2374_v32 = vld [vmem:[%s2468_s5] ss:$0 sm:$0xff] }
 0x791   :  { %869 = vrot.lane.b32.xlu1 %v867_v34, %s1800_s3  ;;  %v162_v34 = vadd.f32 %v2235_v9, %v1918_v17 }
 0x7a4   :  { %v926_v55 = vpop.permute.xlu0 %925 }
 0x7a5   :  { %v928_v59 = vmul.f32 %v926_v55, %v920_v57 }
 0x7a7   :  { %930 = vrot.lane.b32.xlu2 %v928_v59, %s1801_s18 }
 0x801   :  { %v931_v63 = vpop.permute.xlu2 %930 }
 0x802   :  { %v2339_v2 = vadd.f32 %v931_v63, %v923_v61 }
 0x803   :  { %v870_v22 = vpop.permute.xlu1 %869 }
 0x804   :  { %1674 = vtanh.f32 %v2339_v2  ;;  %v2343_v23 = vadd.f32 %v870_v22, %v862_v56 }
 0x806   :  { %1676 = vtanh.f32 %v2343_v23 }
 0x807   :  { %1678 = vpow2.f32 %v1561_v53 }
 0x80a   :  { %v1675_v24 = vpop.eup %1674 }
 0x80b   :  { %936 = vrot.lane.b32.xlu1 %v1675_v24, %s1801_s18 }
 0x80c   :  { %v1677_v25 = vpop.eup %1676 }
 0x80d   :  { %875 = vrot.lane.b32.xlu0 %v1677_v25, %s1800_s3  ;;  %v1679_v41 = vpop.eup %1678 }
 0x80e   :  { %v830_v42 = vadd.f32 1.0, %v1679_v41 }
 0x810   :  { %1680 = vrcp.f32 %v830_v42  ;;  %v857_v27 = vand.u32 2147483648, %v830_v42  ;;  %vm851_vm0 = vweird.f32 %v830_v42  ;;  %v855_v49 = vand.u32 2147483647, %v830_v42 }
 0x812   :  { %v858_v54 = vor.u32 1.1754944e-38, %v857_v27  ;;  %vm856_vm3 = vcmp.eq.f32.partialorder %v855_v49, 8.507059e+37 }
 0x816   :  { %v1681_v50 = vpop.eup %1680 }
 0x817   :  { %v847_v47 = vmul.f32 %v1681_v50, %v830_v42  ;;  %vm852_vm15 = vweird.f32 %v1681_v50 }
 0x818   :  { %vm853_vm2 = vmor %vm851_vm0, %vm852_vm15 }
 0x819   :  { %v848_v48 = vsub.f32 1.0, %v847_v47 }
 0x81b   :  { %v849_v45 = vmul.f32 %v1681_v50, %v848_v48 }
 0x81d   :  { %v850_v7 = vadd.f32 %v1681_v50, %v849_v45 }
 0x81f   :  { %v854_v46 = vsel %vm853_vm2, %v1681_v50, %v850_v7 }
 0x820   :  { %v859_v4 = vsel %vm856_vm3, %v858_v54, %v854_v46 }
 0x87d   :  { %v937_v51 = vpop.permute.xlu1 %936 }
 0x87e   :  { %v939_v0 = vmul.f32 %v937_v51, %v920_v57 }
 0x87f   :  { %v876_v36 = vpop.permute.xlu0 %875 }
 0x880   :  { %v878_v5 = vmul.f32 %v876_v36, %v859_v4 }
 0x882   :  { %v1046_v14 = vsel %vm271_vm10, %v878_v5, %v939_v0  ;;  %1564 = vmatmul.msk.f32.vlgmr.msra.gmra.mxu2 %vm271_vm10, %v878_v5 }
 0x883   :  { %1568 = vmatmul.msk.f32.vlgmr.msrb.gmra.mxu3 %vm378_vm11, %v1046_v14  ;;  %1221 = vmatpush.msra.mxu2 %v2279_v58 }
 0x885   :  { %1222 = vmatpush.msra.mxu2 %v2285_v60 }
 0x887   :  { %1223 = vmatpush.msra.mxu2 %v2291_v62 }
 0x889   :  { %1224 = vmatpush.msra.mxu2 %v2297_v1 }
 0x88a   :  { %1565 = vmatmul.msk.f32.vlgmr.msrb.gmra.mxu2 %vm271_vm10, %v878_v5 }
 0x88b   :  { %1225 = vmatpush.msra.mxu2 %v2303_v52 }
 0x88d   :  { %1226 = vmatpush.msra.mxu2 %v2309_v26 }
 0x88f   :  { %1227 = vmatpush.msra.mxu2 %v2312_v15 }
 0x891   :  { %1228 = vmatpush.msra.mxu2 %v2315_v18 }
 0x893   :  { %1229 = vmatpush.msra.mxu2 %v2318_v19 }
 0x895   :  { %1230 = vmatpush.msra.mxu2 %v2321_v20 }
 0x897   :  { %1231 = vmatpush.msra.mxu2 %v2363_v3 }
 0x899   :  { %1232 = vmatpush.msra.mxu2 %v2366_v16 }
 0x905   :  { %v965_v29 = vpop.f32.mrf.mxu2 }
 0x906   :  { %v988_v30 = vadd.f32 %v965_v29, %v121_v6  ;;  %v1067_v31 = vpop.f32.mrf.mxu3 }
 0x907   :  { %v1068_v33 = vadd.f32 %v2374_v32, %v1067_v31 }
 0x908   :  { %v1566_v28 = vmul.f32 -1.442695, %v988_v30 }
 0x909   :  { %1682 = vtanh.f32 %v1068_v33  ;;  %v1569_v43 = vmul.f32 -1.442695, %v1068_v33 }
 0x90d   :  { %v985_v35 = vpop.f32.mrf.mxu2 }
 0x90e   :  { %v989_v37 = vadd.f32 %v985_v35, %v162_v34 }
 0x90f   :  { %v1683_v38 = vpop.eup %1682 }
 0x910   :  { %1684 = vtanh.f32 %v989_v37  ;;  %1092 = vrot.lane.b32.xlu0 %v1683_v38, %s1801_s18  ;;  %v1567_v34 = vmul.f32 -1.442695, %v989_v37 }
 0x911   :  { %1686 = vpow2.f32 %v1566_v28 }
 0x916   :  { %v1685_v8 = vpop.eup %1684 }
 0x917   :  { %1031 = vrot.lane.b32.xlu2 %v1685_v8, %s1800_s3  ;;  %v1687_v39 = vpop.eup %1686 }
 0x918   :  { %v996_v40 = vadd.f32 1.0, %v1687_v39 }
 0x91a   :  { %1688 = vrcp.f32 %v996_v40  ;;  %v1009_v56 = vand.u32 2147483648, %v996_v40  ;;  %vm1003_vm5 = vweird.f32 %v996_v40  ;;  %v1007_v24 = vand.u32 2147483647, %v996_v40 }
 0x91b   :  { %1690 = vpow2.f32 %v1569_v43 }
 0x91c   :  { %v1010_v53 = vor.u32 1.1754944e-38, %v1009_v56  ;;  %vm1008_vm7 = vcmp.eq.f32.partialorder %v1007_v24, 8.507059e+37 }
 0x920   :  { %v1689_v44 = vpop.eup %1688 }
 0x921   :  { %v999_v55 = vmul.f32 %v1689_v44, %v996_v40  ;;  %v1691_v57 = vpop.eup %1690  ;;  %vm1004_vm4 = vweird.f32 %v1689_v44 }
 0x922   :  { %v1073_v9 = vadd.f32 1.0, %v1691_v57  ;;  %vm1005_vm6 = vmor %vm1003_vm5, %vm1004_vm4 }
 0x923   :  { %v1000_v59 = vsub.f32 1.0, %v999_v55 }
 0x924   :  { %1692 = vrcp.f32 %v1073_v9  ;;  %v1085_v27 = vand.u32 2147483648, %v1073_v9  ;;  %vm1079_vm8 = vweird.f32 %v1073_v9  ;;  %v1083_v49 = vand.u32 2147483647, %v1073_v9 }
 0x925   :  { %v1001_v61 = vmul.f32 %v1689_v44, %v1000_v59 }
 0x926   :  { %v1086_v51 = vor.u32 1.1754944e-38, %v1085_v27  ;;  %vm1084_vm12 = vcmp.eq.f32.partialorder %v1083_v49, 8.507059e+37 }
 0x927   :  { %v1002_v63 = vadd.f32 %v1689_v44, %v1001_v61 }
 0x929   :  { %v1006_v25 = vsel %vm1005_vm6, %v1689_v44, %v1002_v63 }
 0x92a   :  { %v1693_v22 = vpop.eup %1692  ;;  %v1011_v42 = vsel %vm1008_vm7, %v1010_v53, %v1006_v25 }
 0x92b   :  { %v1075_v41 = vmul.f32 %v1693_v22, %v1073_v9  ;;  %vm1080_vm1 = vweird.f32 %v1693_v22  ;;  %v1029_v6 = vmul.f32 %v1011_v42, %v2343_v23 }
 0x92c   :  { %vm1081_vm9 = vmor %vm1079_vm8, %vm1080_vm1 }
 0x92d   :  { %v1076_v48 = vsub.f32 1.0, %v1075_v41 }
 0x92f   :  { %v1077_v45 = vmul.f32 %v1693_v22, %v1076_v48 }
 0x931   :  { %v1078_v7 = vadd.f32 %v1693_v22, %v1077_v45 }
 0x933   :  { %v1082_v46 = vsel %vm1081_vm9, %v1693_v22, %v1078_v7 }
 0x934   :  { %v1087_v4 = vsel %vm1084_vm12, %v1086_v51, %v1082_v46 }
 0x935   :  { %v1090_v0 = vmul.f32 %v1087_v4, %v2339_v2 }
 0x971   :  { %v1032_v50 = vpop.permute.xlu2 %1031 }
 0x972   :  { %v1034_v47 = vmul.f32 %v1032_v50, %v1011_v42 }
 0x974   :  { %1036 = vrot.lane.b32.xlu1 %v1034_v47, %s1800_s3 }
 0x982   :  { %v1093_v54 = vpop.permute.xlu0 %1092 }
 0x983   :  { %v1095_v36 = vmul.f32 %v1093_v54, %v1087_v4 }
 0x985   :  { %1097 = vrot.lane.b32.xlu2 %v1095_v36, %s1801_s18 }
 0x9df   :  { %v1098_v5 = vpop.permute.xlu2 %1097 }
 0x9e0   :  { %v2384_v14 = vadd.f32 %v1098_v5, %v1090_v0 }
 0x9e2   :  { %1694 = vtanh.f32 %v2384_v14 }
 0x9e6   :  { %v1037_v29 = vpop.permute.xlu1 %1036 }
 0x9e7   :  { %v2388_v30 = vadd.f32 %v1037_v29, %v1029_v6 }
 0x9e8   :  { %v1695_v31 = vpop.eup %1694 }
 0x9e9   :  { %1696 = vtanh.f32 %v2388_v30  ;;  %1103 = vrot.lane.b32.xlu1 %v1695_v31, %s1801_s18 }
 0x9ea   :  { %1698 = vpow2.f32 %v1567_v34 }
 0x9ef   :  { %v1697_v33 = vpop.eup %1696 }
 0x9f0   :  { %1042 = vrot.lane.b32.xlu0 %v1697_v33, %s1800_s3  ;;  %v1699_v2 = vpop.eup %1698 }
 0x9f1   :  { %v997_v35 = vadd.f32 1.0, %v1699_v2 }
 0x9f3   :  { %1700 = vrcp.f32 %v997_v35  ;;  %v1024_v40 = vand.u32 2147483648, %v997_v35  ;;  %vm1018_vm14 = vweird.f32 %v997_v35  ;;  %v1022_v43 = vand.u32 2147483647, %v997_v35 }
 0x9f5   :  { %v1025_v57 = vor.u32 1.1754944e-38, %v1024_v40  ;;  %vm1023_vm0 = vcmp.eq.f32.partialorder %v1022_v43, 8.507059e+37 }
 0x9f9   :  { %v1701_v38 = vpop.eup %1700 }
 0x9fa   :  { %v1014_v8 = vmul.f32 %v1701_v38, %v997_v35  ;;  %vm1019_vm13 = vweird.f32 %v1701_v38 }
 0x9fb   :  { %vm1020_vm15 = vmor %vm1018_vm14, %vm1019_vm13 }
 0x9fc   :  { %v1015_v28 = vsub.f32 1.0, %v1014_v8 }
 0x9fe   :  { %v1016_v23 = vmul.f32 %v1701_v38, %v1015_v28 }
 0xa00   :  { %v1017_v39 = vadd.f32 %v1701_v38, %v1016_v23 }
 0xa02   :  { %v1021_v44 = vsel %vm1020_vm15, %v1701_v38, %v1017_v39 }
 0xa03   :  { %v1026_v37 = vsel %vm1023_vm0, %v1025_v57, %v1021_v44 }
 0xa5b   :  { %v1104_v55 = vpop.permute.xlu1 %1103 }
 0xa5c   :  { %v1106_v59 = vmul.f32 %v1104_v55, %v1087_v4 }
 0xa62   :  { %v1043_v9 = vpop.permute.xlu0 %1042 }
 0xa63   :  { %v1045_v61 = vmul.f32 %v1043_v9, %v1026_v37 }
 0xa65   :  { %v1213_v63 = vsel %vm271_vm10, %v1045_v61, %v1106_v59  ;;  %1570 = vmatmul.msk.f32.vlgmr.msra.gmra.mxu1 %vm271_vm10, %v1045_v61  ;;  %1571 = vmatmul.msk.f32.vlgmr.msrb.gmra.mxu0 %vm271_vm10, %v1045_v61 }
 0xa66   :  { %1574 = vmatmul.msk.f32.vlgmr.msra.gmra.mxu2 %vm378_vm11, %v1213_v63  ;;  %1449 = vmatpush.msra.mxu1 %v2279_v58  ;;  %v165_v58 = vadd.f32 %v2239_v11, %v1918_v17 }
 0xa68   :  { %1450 = vmatpush.msra.mxu1 %v2285_v60 }
 0xa6a   :  { %1451 = vmatpush.msra.mxu1 %v2291_v62 }
 0xa6c   :  { %1452 = vmatpush.msra.mxu1 %v2297_v1 }
 0xa6e   :  { %1453 = vmatpush.msra.mxu1 %v2303_v52 }
 0xa70   :  { %1454 = vmatpush.msra.mxu1 %v2309_v26 }
 0xa72   :  { %1455 = vmatpush.msra.mxu1 %v2312_v15 }
 0xa74   :  { %1456 = vmatpush.msra.mxu1 %v2315_v18 }
 0xa76   :  { %1457 = vmatpush.msra.mxu1 %v2318_v19  ;;  %v124_v19 = vadd.f32 %v2237_v10, %v1925_v21 }
 0xa78   :  { %1458 = vmatpush.msra.mxu1 %v2321_v20 }
 0xa7a   :  { %1459 = vmatpush.msra.mxu1 %v2363_v3 }
 0xa7c   :  { %1460 = vmatpush.msra.mxu1 %v2366_v16 }
 0xae2   :  { %v1152_v60 = vpop.f32.mrf.mxu0  ;;  %v1132_v18 = vpop.f32.mrf.mxu1 }
 0xae3   :  { %v2411_v62 = vadd.f32 %v1152_v60, %v165_v58  ;;  %v1155_v11 = vadd.f32 %v1132_v18, %v124_v19  ;;  %v168_v18 = vadd.f32 %v2243_v13, %v1918_v17 }
 0xae5   :  { %1702 = vtanh.f32 %v2411_v62  ;;  %v1572_v20 = vmul.f32 -1.442695, %v1155_v11 }
 0xae9   :  { %v1234_v1 = vpop.f32.mrf.mxu2 }
 0xaea   :  { %v1235_v52 = vadd.f32 %v2374_v32, %v1234_v1 }
 0xaeb   :  { %v1703_v26 = vpop.eup %1702 }
 0xaec   :  { %1704 = vtanh.f32 %v1235_v52  ;;  %1198 = vrot.lane.b32.xlu2 %v1703_v26, %s1800_s3  ;;  %v1575_v25 = vmul.f32 -1.442695, %v1235_v52 }
 0xaed   :  { %1706 = vpow2.f32 %v1572_v20 }
 0xaf2   :  { %v1705_v15 = vpop.eup %1704 }
 0xaf3   :  { %1259 = vrot.lane.b32.xlu0 %v1705_v15, %s1801_s18  ;;  %v1707_v3 = vpop.eup %1706 }
 0xaf4   :  { %v1163_v16 = vadd.f32 1.0, %v1707_v3 }
 0xaf6   :  { %1708 = vrcp.f32 %v1163_v16  ;;  %v1176_v42 = vand.u32 2147483648, %v1163_v16  ;;  %vm1170_vm3 = vweird.f32 %v1163_v16  ;;  %v1174_v50 = vand.u32 2147483647, %v1163_v16 }
 0xaf7   :  { %1710 = vpow2.f32 %v1575_v25 }
 0xaf8   :  { %v1177_v48 = vor.u32 1.1754944e-38, %v1176_v42  ;;  %vm1175_vm5 = vcmp.eq.f32.partialorder %v1174_v50, 8.507059e+37 }
 0xafc   :  { %v1709_v56 = vpop.eup %1708 }
 0xafd   :  { %v1166_v22 = vmul.f32 %v1709_v56, %v1163_v16  ;;  %vm1171_vm2 = vweird.f32 %v1709_v56  ;;  %v1711_v47 = vpop.eup %1710 }
 0xafe   :  { %vm1172_vm4 = vmor %vm1170_vm3, %vm1171_vm2  ;;  %v1240_v45 = vadd.f32 1.0, %v1711_v47 }
 0xaff   :  { %v1167_v24 = vsub.f32 1.0, %v1166_v22 }
 0xb00   :  { %1712 = vrcp.f32 %v1240_v45  ;;  %v1252_v0 = vand.u32 2147483648, %v1240_v45  ;;  %vm1246_vm7 = vweird.f32 %v1240_v45  ;;  %v1250_v5 = vand.u32 2147483647, %v1240_v45 }
 0xb01   :  { %v1168_v53 = vmul.f32 %v1709_v56, %v1167_v24  ;;  %v127_v24 = vadd.f32 %v2241_v12, %v1925_v21 }
 0xb02   :  { %v1253_v29 = vor.u32 1.1754944e-38, %v1252_v0  ;;  %vm1251_vm8 = vcmp.eq.f32.partialorder %v1250_v5, 8.507059e+37 }
 0xb03   :  { %v1169_v41 = vadd.f32 %v1709_v56, %v1168_v53 }
 0xb05   :  { %v1173_v10 = vsel %vm1172_vm4, %v1709_v56, %v1169_v41 }
 0xb06   :  { %v1178_v27 = vsel %vm1175_vm5, %v1177_v48, %v1173_v10  ;;  %v1713_v46 = vpop.eup %1712 }
 0xb07   :  { %v1242_v51 = vmul.f32 %v1713_v46, %v1240_v45  ;;  %vm1247_vm6 = vweird.f32 %v1713_v46  ;;  %v1196_v2 = vmul.f32 %v1178_v27, %v2388_v30  ;;  %v1573_v30 = vmul.f32 -1.442695, %v2411_v62 }
 0xb08   :  { %vm1248_vm1 = vmor %vm1246_vm7, %vm1247_vm6 }
 0xb09   :  { %v1243_v54 = vsub.f32 1.0, %v1242_v51 }
 0xb0b   :  { %v1244_v4 = vmul.f32 %v1713_v46, %v1243_v54 }
 0xb0d   :  { %v1245_v36 = vadd.f32 %v1713_v46, %v1244_v4 }
 0xb0f   :  { %v1249_v6 = vsel %vm1248_vm1, %v1713_v46, %v1245_v36 }
 0xb10   :  { %v1254_v33 = vsel %vm1251_vm8, %v1253_v29, %v1249_v6 }
 0xb11   :  { %v1257_v8 = vmul.f32 %v1254_v33, %v2384_v14 }
 0xb46   :  { %v1199_v7 = vpop.permute.xlu2 %1198 }
 0xb47   :  { %v1201_v49 = vmul.f32 %v1199_v7, %v1178_v27 }
 0xb49   :  { %1203 = vrot.lane.b32.xlu1 %v1201_v49, %s1800_s3 }
 0xb65   :  { %v1260_v31 = vpop.permute.xlu0 %1259 }
 0xb66   :  { %v1262_v34 = vmul.f32 %v1260_v31, %v1254_v33 }
 0xb68   :  { %1264 = vrot.lane.b32.xlu2 %v1262_v34, %s1801_s18 }
 0xbbb   :  { %v1204_v35 = vpop.permute.xlu1 %1203 }
 0xbbc   :  { %v2422_v38 = vadd.f32 %v1204_v35, %v1196_v2 }
 0xbbe   :  { %1714 = vtanh.f32 %v2422_v38 }
 0xbc2   :  { %v1265_v28 = vpop.permute.xlu2 %1264 }
 0xbc3   :  { %v2426_v23 = vadd.f32 %v1265_v28, %v1257_v8 }
 0xbc4   :  { %v1715_v39 = vpop.eup %1714 }
 0xbc5   :  { %1716 = vtanh.f32 %v2426_v23  ;;  %1209 = vrot.lane.b32.xlu0 %v1715_v39, %s1800_s3 }
 0xbc6   :  { %1718 = vpow2.f32 %v1573_v30 }
 0xbcb   :  { %v1717_v40 = vpop.eup %1716 }
 0xbcc   :  { %1270 = vrot.lane.b32.xlu1 %v1717_v40, %s1801_s18  ;;  %v1719_v43 = vpop.eup %1718 }
 0xbcd   :  { %v1164_v44 = vadd.f32 1.0, %v1719_v43 }
 0xbcf   :  { %1720 = vrcp.f32 %v1164_v44  ;;  %v1191_v59 = vand.u32 2147483648, %v1164_v44  ;;  %vm1185_vm12 = vweird.f32 %v1164_v44  ;;  %v1189_v61 = vand.u32 2147483647, %v1164_v44 }
 0xbd1   :  { %v1192_v58 = vor.u32 1.1754944e-38, %v1191_v59  ;;  %vm1190_vm14 = vcmp.eq.f32.partialorder %v1189_v61, 8.507059e+37 }
 0xbd5   :  { %v1721_v55 = vpop.eup %1720 }
 0xbd6   :  { %v1181_v57 = vmul.f32 %v1721_v55, %v1164_v44  ;;  %vm1186_vm9 = vweird.f32 %v1721_v55 }
 0xbd7   :  { %vm1187_vm13 = vmor %vm1185_vm12, %vm1186_vm9 }
 0xbd8   :  { %v1182_v14 = vsub.f32 1.0, %v1181_v57 }
 0xbda   :  { %v1183_v9 = vmul.f32 %v1721_v55, %v1182_v14 }
 0xbdc   :  { %v1184_v37 = vadd.f32 %v1721_v55, %v1183_v9 }
 0xbde   :  { %v1188_v63 = vsel %vm1187_vm13, %v1721_v55, %v1184_v37 }
 0xbdf   :  { %v1193_v60 = vsel %vm1190_vm14, %v1192_v58, %v1188_v63 }
 0xc37   :  { %v1210_v1 = vpop.permute.xlu0 %1209 }
 0xc38   :  { %v1212_v62 = vmul.f32 %v1210_v1, %v1193_v60 }
 0xc3a   :  { %1576 = vmatmul.msk.f32.vlgmr.msrb.gmra.mxu1 %vm271_vm10, %v1212_v62  ;;  %1577 = vmatmul.msk.f32.vlgmr.msra.gmra.mxu3 %vm271_vm10, %v1212_v62 }
 0xc3e   :  { %v1271_v52 = vpop.permute.xlu1 %1270 }
 0xc3f   :  { %v1273_v26 = vmul.f32 %v1271_v52, %v1254_v33 }
 0xc41   :  { %v1380_v15 = vsel %vm271_vm10, %v1212_v62, %v1273_v26 }
 0xc42   :  { %1580 = vmatmul.msk.f32.vlgmr.msra.gmra.mxu0 %vm378_vm11, %v1380_v15 }
 0xcb7   :  { %v1299_v22 = vpop.f32.mrf.mxu1 }
 0xcb8   :  { %v1322_v17 = vadd.f32 %v1299_v22, %v127_v24 }
 0xcba   :  { %v1578_v13 = vmul.f32 -1.442695, %v1322_v17 }
 0xcbd   :  { %v1319_v19 = vpop.f32.mrf.mxu3 }
 0xcbe   :  { %v2438_v11 = vadd.f32 %v1319_v19, %v168_v18 }
 0xcbf   :  { %v1401_v20 = vpop.f32.mrf.mxu0 }
 0xcc0   :  { %1722 = vtanh.f32 %v2438_v11  ;;  %v1402_v3 = vadd.f32 %v2374_v32, %v1401_v20  ;;  %v1579_v14 = vmul.f32 -1.442695, %v2438_v11 }
 0xcc2   :  { %1724 = vtanh.f32 %v1402_v3  ;;  %v1581_v50 = vmul.f32 -1.442695, %v1402_v3 }
 0xcc3   :  { %1726 = vpow2.f32 %v1578_v13 }
 0xcc6   :  { %v1723_v16 = vpop.eup %1722 }
 0xcc7   :  { %1365 = vrot.lane.b32.xlu2 %v1723_v16, %s1800_s3 }
 0xcc8   :  { %v1725_v56 = vpop.eup %1724 }
 0xcc9   :  { %1426 = vrot.lane.b32.xlu0 %v1725_v56, %s1801_s18  ;;  %v1727_v25 = vpop.eup %1726 }
 0xcca   :  { %v1330_v53 = vadd.f32 1.0, %v1727_v25 }
 0xccc   :  { %1728 = vrcp.f32 %v1330_v53  ;;  %v1343_v7 = vand.u32 2147483648, %v1330_v53  ;;  %vm1337_vm0 = vweird.f32 %v1330_v53  ;;  %v1341_v49 = vand.u32 2147483647, %v1330_v53 }
 0xccd   :  { %1730 = vpow2.f32 %v1581_v50 }
 0xcce   :  { %v1344_v12 = vor.u32 1.1754944e-38, %v1343_v7  ;;  %vm1342_vm3 = vcmp.eq.f32.partialorder %v1341_v49, 8.507059e+37 }
 0xcd2   :  { %v1729_v41 = vpop.eup %1728 }
 0xcd3   :  { %v1333_v42 = vmul.f32 %v1729_v41, %v1330_v53  ;;  %v1731_v48 = vpop.eup %1730  ;;  %vm1338_vm15 = vweird.f32 %v1729_v41 }
 0xcd4   :  { %v1407_v27 = vadd.f32 1.0, %v1731_v48  ;;  %vm1339_vm2 = vmor %vm1337_vm0, %vm1338_vm15  ;;  %vm1506_vm15 = vcmask 261120  }
 0xcd5   :  { %v1334_v47 = vsub.f32 1.0, %v1333_v42 }
 0xcd6   :  { %1732 = vrcp.f32 %v1407_v27  ;;  %v1419_v29 = vand.u32 2147483648, %v1407_v27  ;;  %vm1413_vm5 = vweird.f32 %v1407_v27  ;;  %v1417_v31 = vand.u32 2147483647, %v1407_v27 }
 0xcd7   :  { %v1335_v10 = vmul.f32 %v1729_v41, %v1334_v47 }
 0xcd8   :  { %v1420_v34 = vor.u32 1.1754944e-38, %v1419_v29  ;;  %vm1418_vm7 = vcmp.eq.f32.partialorder %v1417_v31, 8.507059e+37 }
 0xcd9   :  { %v1336_v45 = vadd.f32 %v1729_v41, %v1335_v10 }
 0xcdb   :  { %v1340_v21 = vsel %vm1339_vm2, %v1729_v41, %v1336_v45 }
 0xcdc   :  { %v1345_v51 = vsel %vm1342_vm3, %v1344_v12, %v1340_v21  ;;  %v1733_v4 = vpop.eup %1732 }
 0xcdd   :  { %v1409_v36 = vmul.f32 %v1733_v4, %v1407_v27  ;;  %vm1414_vm4 = vweird.f32 %v1733_v4  ;;  %v1363_v28 = vmul.f32 %v1345_v51, %v2422_v38 }
 0xcde   :  { %vm1415_vm6 = vmor %vm1413_vm5, %vm1414_vm4 }
 0xcdf   :  { %v1410_v0 = vsub.f32 1.0, %v1409_v36 }
 0xce1   :  { %v1411_v5 = vmul.f32 %v1733_v4, %v1410_v0 }
 0xce3   :  { %v1412_v6 = vadd.f32 %v1733_v4, %v1411_v5 }
 0xce5   :  { %v1416_v33 = vsel %vm1415_vm6, %v1733_v4, %v1412_v6 }
 0xce6   :  { %v1421_v35 = vsel %vm1418_vm7, %v1420_v34, %v1416_v33 }
 0xce7   :  { %v1424_v30 = vmul.f32 %v1421_v35, %v2426_v23 }
 0xd21   :  { %v1366_v46 = vpop.permute.xlu2 %1365 }
 0xd22   :  { %v1368_v54 = vmul.f32 %v1366_v46, %v1345_v51 }
 0xd24   :  { %1370 = vrot.lane.b32.xlu1 %v1368_v54, %s1800_s3 }
 0xd3b   :  { %v1427_v2 = vpop.permute.xlu0 %1426 }
 0xd3c   :  { %v1429_v8 = vmul.f32 %v1427_v2, %v1421_v35 }
 0xd3e   :  { %1431 = vrot.lane.b32.xlu2 %v1429_v8, %s1801_s18 }
 0xd96   :  { %v1371_v39 = vpop.permute.xlu1 %1370 }
 0xd97   :  { %v1373_v40 = vadd.f32 %v1371_v39, %v1363_v28 }
 0xd98   :  { %v1432_v43 = vpop.permute.xlu2 %1431 }
 0xd99   :  { %1734 = vtanh.f32 %v1373_v40  ;;  %v1434_v44 = vadd.f32 %v1432_v43, %v1424_v30 }
 0xd9b   :  { %1736 = vtanh.f32 %v1434_v44 }
 0xd9c   :  { %1738 = vpow2.f32 %v1579_v14 }
 0xd9f   :  { %v1735_v55 = vpop.eup %1734 }
 0xda0   :  { %1376 = vrot.lane.b32.xlu0 %v1735_v55, %s1800_s3 }
 0xda1   :  { %v1737_v57 = vpop.eup %1736 }
 0xda2   :  { %1437 = vrot.lane.b32.xlu1 %v1737_v57, %s1801_s18  ;;  %v1739_v9 = vpop.eup %1738 }
 0xda3   :  { %v1331_v37 = vadd.f32 1.0, %v1739_v9 }
 0xda5   :  { %1740 = vrcp.f32 %v1331_v37  ;;  %v1358_v58 = vand.u32 2147483648, %v1331_v37  ;;  %vm1352_vm8 = vweird.f32 %v1331_v37  ;;  %v1356_v60 = vand.u32 2147483647, %v1331_v37 }
 0xda7   :  { %v1359_v62 = vor.u32 1.1754944e-38, %v1358_v58  ;;  %vm1357_vm12 = vcmp.eq.f32.partialorder %v1356_v60, 8.507059e+37 }
 0xdab   :  { %v1741_v38 = vpop.eup %1740 }
 0xdac   :  { %v1348_v59 = vmul.f32 %v1741_v38, %v1331_v37  ;;  %vm1353_vm1 = vweird.f32 %v1741_v38 }
 0xdad   :  { %vm1354_vm9 = vmor %vm1352_vm8, %vm1353_vm1 }
 0xdae   :  { %v1349_v61 = vsub.f32 1.0, %v1348_v59 }
 0xdb0   :  { %v1350_v23 = vmul.f32 %v1741_v38, %v1349_v61 }
 0xdb2   :  { %v1351_v63 = vadd.f32 %v1741_v38, %v1350_v23 }
 0xdb4   :  { %v1355_v1 = vsel %vm1354_vm9, %v1741_v38, %v1351_v63 }
 0xdb5   :  { %v1360_v26 = vsel %vm1357_vm12, %v1359_v62, %v1355_v1 }
 0xe12   :  { %v1377_v52 = vpop.permute.xlu0 %1376 }
 0xe13   :  { %v1379_v18 = vmul.f32 %v1377_v52, %v1360_v26 }
 0xe14   :  { %v1438_v15 = vpop.permute.xlu1 %1437 }
 0xe15   :  { %v1440_v19 = vmul.f32 %v1438_v15, %v1421_v35 }
 0xe17   :  { %v1441_v11 = vsel %vm271_vm10, %v1379_v18, %v1440_v19 }
 0xe18   :  { %1582 = vmatmul.msk.f32.vlgmr.msra.gmra.mxu1 %vm378_vm11, %v1441_v11 }
 0xe95   :  { %v1462_v20 = vpop.f32.mrf.mxu1 }
 0xe96   :  { %v1463_v3 = vadd.f32 %v2374_v32, %v1462_v20 }
 0xe98   :  { %1742 = vtanh.f32 %v1463_v3  ;;  %v1583_v56 = vmul.f32 -1.442695, %v1463_v3 }
 0xe9a   :  { %1744 = vpow2.f32 %v1583_v56 }
 0xe9e   :  { %v1743_v16 = vpop.eup %1742 }
 0xe9f   :  { %1487 = vrot.lane.b32.xlu2 %v1743_v16, %s1801_s18 }
 0xea0   :  { %v1745_v22 = vpop.eup %1744 }
 0xea1   :  { %v1468_v24 = vadd.f32 1.0, %v1745_v22 }
 0xea3   :  { %1746 = vrcp.f32 %v1468_v24  ;;  %v1480_v42 = vand.u32 2147483648, %v1468_v24  ;;  %vm1474_vm11 = vweird.f32 %v1468_v24  ;;  %v1478_v50 = vand.u32 2147483647, %v1468_v24 }
 0xea5   :  { %v1481_v47 = vor.u32 1.1754944e-38, %v1480_v42  ;;  %vm1479_vm14 = vcmp.eq.f32.partialorder %v1478_v50, 8.507059e+37 }
 0xea9   :  { %v1747_v17 = vpop.eup %1746 }
 0xeaa   :  { %v1470_v13 = vmul.f32 %v1747_v17, %v1468_v24  ;;  %vm1475_vm10 = vweird.f32 %v1747_v17 }
 0xeab   :  { %vm1476_vm13 = vmor %vm1474_vm11, %vm1475_vm10 }
 0xeac   :  { %v1471_v25 = vsub.f32 1.0, %v1470_v13 }
 0xeae   :  { %v1472_v53 = vmul.f32 %v1747_v17, %v1471_v25 }
 0xeb0   :  { %v1473_v41 = vadd.f32 %v1747_v17, %v1472_v53 }
 0xeb2   :  { %v1477_v32 = vsel %vm1476_vm13, %v1747_v17, %v1473_v41 }
 0xeb3   :  { %v1482_v48 = vsel %vm1479_vm14, %v1481_v47, %v1477_v32 }
 0xeb4   :  { %v1485_v7 = vmul.f32 %v1482_v48, %v1434_v44 }
 0xef9   :  { %v1488_v10 = vpop.permute.xlu2 %1487 }
 0xefa   :  { %v1490_v45 = vmul.f32 %v1488_v10, %v1482_v48 }
 0xefc   :  { %1492 = vrot.lane.b32.xlu0 %v1490_v45, %s1801_s18 }
 0xf6e   :  { %v1493_v27 = vpop.permute.xlu0 %1492 }
 0xf6f   :  { %v1495_v49 = vadd.f32 %v1493_v27, %v1485_v7 }
 0xf71   :  { %1748 = vtanh.f32 %v1495_v49 }
 0xf77   :  { %v1749_v21 = vpop.eup %1748 }
 0xf78   :  { %1498 = vrot.lane.b32.xlu1 %v1749_v21, %s1801_s18 }
 0xfea   :  { %v1499_v12 = vpop.permute.xlu1 %1498 }
 0xfeb   :  { %v1501_v46 = vmul.f32 %v1499_v12, %v1482_v48 }
 0xfed   :  { %1503 = vrot.lane.b32.xlu2 %v1501_v46, %s1800_s3 }
0x1047   :  { %v1504_v51 = vpop.permute.xlu2 %1503 }
0x1048   :  { %1507 = vst.msk [vmem:[%s2469_s6] sm:$0xff] %vm1506_vm15, %v1504_v51 }
0x1049   :  { %1512 = vsyncpa [#allocation4], 1 }

</bundles_post_ra>
